<compile_context>
chip_gen: v7x
topology: tpu7x:2x2x1
jax: 0.10.0
libtpu: 0.0.40
codegen_flags: <defaults>
</compile_context>

<pallas_src>
import functools

import jax
import jax.numpy as jnp
from jax.experimental import pallas as pl
from jax.experimental.pallas import tpu as pltpu


# ----------------------------------------------------------------------------
# Kernels
# ----------------------------------------------------------------------------
def _conv1_pool_kernel(p1_ref, w1_ref, b1_ref, o_ref):
    """conv1 (3x3) + bias + ReLU + 2x2 maxpool as one transposed GEMM.

    p1_ref: (1, 16, L) bf16  L = BT*169 lanes (image-major, position-minor);
                             the 16 sublanes are the 4x4 union-patch cells.
    w1_ref: (64, 16)   bf16  4 pooling-window row groups x 16 out channels.
    b1_ref: (64, 1)    f32
    o_ref : (1, 16, L) bf16  pooled conv1 activations, channel on sublanes.
    """
    x = p1_ref[0]                                                  # (16, L)
    h = jnp.dot(w1_ref[...], x, preferred_element_type=jnp.float32)
    h = jnp.maximum(h + b1_ref[...], 0.0)                          # (64, L)
    pooled = jnp.maximum(jnp.maximum(h[0:16], h[16:32]),
                         jnp.maximum(h[32:48], h[48:64]))          # (16, L)
    o_ref[0] = pooled.astype(o_ref.dtype)


def _conv2_fc_kernel(p2_ref, w2e_ref, b2e_ref, wfc1_ref, bfc1_ref,
                     wfc2_ref, bfc2_ref, o_ref, flat_ref):
    """conv2+relu+pool + fc1+relu + fc2, fully fused per batch tile.

    p2_ref  : (25*BT, 400) bf16  row p*BT+b = 5x5x16 union patch of image b at
                                 pooled-output position p (cell-major, ch-minor)
    w2e_ref : (400, 128) bf16,  b2e_ref : (1, 128) f32
    wfc1_ref: (800, 128) bf16 (padded lanes), bfc1_ref: (1, 128) f32
    wfc2_ref: (128, 128) bf16 (padded lanes), bfc2_ref: (1, 128) f32
    flat_ref: (BT, 800)  f32 VMEM scratch (flattened pooled2 activations)
    o_ref   : (BT, 128)  f32 (wrapper slices [:, :10])
    """
    bt = o_ref.shape[0]
    # conv2 + bias + ReLU for all 25 positions as ONE (25*BT,400)x(400,128) GEMM
    h = jnp.dot(p2_ref[...], w2e_ref[...], preferred_element_type=jnp.float32)
    h = jnp.maximum(h + b2e_ref[...], 0.0)                         # (25*BT,128)
    # 2x2 max-pool = max over the 4 column groups of 32 channels.
    m = jnp.maximum(jnp.maximum(h[:, 0:32], h[:, 32:64]),
                    jnp.maximum(h[:, 64:96], h[:, 96:128]))        # (25*BT,32)
    # Scatter each position's (BT, 32) slab to lane offset p*32 so fc1 becomes
    # a single K=800 GEMM (full MXU contraction fill, no vreg-pressure unroll).
    for p in range(25):
        flat_ref[:, p * 32:(p + 1) * 32] = m[p * bt:(p + 1) * bt, :]
    # fc1 (K=800) + relu, padded to 128 lanes.
    z = jnp.dot(flat_ref[...].astype(wfc1_ref.dtype), wfc1_ref[...],
                preferred_element_type=jnp.float32)
    z = jnp.maximum(z + bfc1_ref[...], 0.0)                        # (BT, 128)
    # fc2 (padded to 128 lanes).
    out = jnp.dot(z.astype(wfc2_ref.dtype), wfc2_ref[...],
                  preferred_element_type=jnp.float32)
    o_ref[...] = (out + bfc2_ref[...]).astype(o_ref.dtype)


# ----------------------------------------------------------------------------
# Weight preparation (one-time, exact transforms of PyTorch-layout params)
# ----------------------------------------------------------------------------
def _expand_conv_pool(wc, bc):
    """Fold KxK valid-conv + 2x2/2 max-pool into one GEMM.

    Each pooled output pixel reads the union (K+1)x(K+1)xIC input patch of its
    2x2 window of conv outputs. Column group g = wy*2+wx holds the filter for
    pooling-window position (wy, wx), zero-padded inside the bigger patch.
    Returns We of shape ((K+1)^2*IC, 4*OC) and be of shape (4*OC,).
    """
    oc, ic, k, _ = wc.shape
    s = k + 1
    we = jnp.zeros((s * s * ic, 4 * oc), jnp.float32)
    for wy in range(2):
        for wx in range(2):
            g = wy * 2 + wx
            for di in range(k):
                for dj in range(k):
                    i, j = wy + di, wx + dj
                    r0 = (i * s + j) * ic
                    we = we.at[r0:r0 + ic, g * oc:(g + 1) * oc].set(
                        wc[:, :, di, dj].T)
    be = jnp.tile(bc, 4)
    return we, be


def prepare_kernel_params(params):
    (wc1, bc1), (wc2, bc2), (w1, b1), (w2, b2) = params
    w1e, b1e = _expand_conv_pool(wc1, bc1)                 # (16, 64), (64,)
    w2e, b2e = _expand_conv_pool(wc2, bc2)                 # (400, 128), (128,)
    # PyTorch flattens pooled2 as (c, y, x); the kernel feeds (p, c). Permute
    # the fc1 weight instead of the activations (exact, free); pad to 128 lanes.
    wfc1 = jnp.transpose(w1.reshape(100, 32, 25), (2, 1, 0)).reshape(800, 100)
    wfc1 = jnp.zeros((800, 128), jnp.float32).at[:, :100].set(wfc1)
    bfc1 = jnp.zeros((1, 128), jnp.float32).at[0, :100].set(b1)
    # fc2 padded to a lane-dense 128x128; wrapper slices [:, :10].
    wfc2 = jnp.zeros((128, 128), jnp.float32).at[:100, :10].set(w2.T)
    bfc2 = jnp.zeros((1, 128), jnp.float32).at[0, :10].set(b2)
    bf16 = jnp.bfloat16
    return dict(
        w1eT=w1e.T.astype(bf16),               # (64, 16)
        b1e=b1e.reshape(64, 1),                # f32
        w2e=w2e.astype(bf16),                  # (400, 128)
        b2e=b2e.reshape(1, 128),               # f32
        wfc1=wfc1.astype(bf16),                # (800, 128)
        bfc1=bfc1,                             # (1, 128) f32
        wfc2=wfc2.astype(bf16),                # (128, 128)
        bfc2=bfc2,                             # (1, 128) f32
    )


# ----------------------------------------------------------------------------
# Forward pass
# ----------------------------------------------------------------------------
def _round_up(n, m):
    return ((n + m - 1) // m) * m


@functools.partial(jax.jit, static_argnames=("block_batch",))
def cnn_mnist_forward(x, kp, block_batch=256):
    """x: (B, 1, 28, 28) float32. Returns (B, 10) float32 logits."""
    B = x.shape[0]
    BT = _round_up(min(block_batch, _round_up(B, 8)), 8)    # batch tile
    Bp = _round_up(B, BT)                                   # padded batch
    nb = Bp // BT                                           # grid steps

    x2 = x.reshape(B, 28, 28)
    if Bp != B:
        x2 = jnp.pad(x2, ((0, Bp - B), (0, 0), (0, 0)))
    x2 = x2.astype(jnp.bfloat16)

    # ---- Stage-1 im2col: union 4x4 patch of every 2x2 pooling window -------
    # p1t[n, k, b*169 + pos] = x[n*BT+b, 2*py + k//4, 2*px + k%4]
    cols = [x2[:, i:i + 25:2, j:j + 25:2] for i in range(4) for j in range(4)]
    p1 = jnp.stack(cols, axis=-1)                           # (Bp, 13, 13, 16)
    p1t = (p1.reshape(Bp, 169, 16)
             .transpose(2, 0, 1)                            # (16, Bp, 169)
             .reshape(16, nb, BT * 169)
             .transpose(1, 0, 2))                           # (nb, 16, BT*169)

    pooled1t = pl.pallas_call(
        _conv1_pool_kernel,
        out_shape=jax.ShapeDtypeStruct((nb, 16, BT * 169), jnp.bfloat16),
        grid=(nb,),
        in_specs=[
            pl.BlockSpec((1, 16, BT * 169), lambda i: (i, 0, 0)),
            pl.BlockSpec((64, 16), lambda i: (0, 0)),       # weights resident
            pl.BlockSpec((64, 1), lambda i: (0, 0)),
        ],
        out_specs=pl.BlockSpec((1, 16, BT * 169), lambda i: (i, 0, 0)),
        compiler_params=pltpu.CompilerParams(
            dimension_semantics=("parallel",)),
    )(p1t, kp["w1eT"], kp["b1e"])

    # ---- Stage-2 im2col: 5x5x16 union windows of pooled1 at stride 2 -------
    # TODO(synk): this window extraction stays in XLA (bf16 hand-off); in-kernel
    # extraction from a VMEM-resident pooled1 tile would cut HBM traffic ~3.7x.
    pooled1 = (pooled1t.transpose(1, 0, 2)                  # (16, nb, BT*169)
                       .reshape(16, Bp, 13, 13)
                       .transpose(1, 2, 3, 0))              # (Bp, 13, 13, 16)
    wins = [pooled1[:, ci:ci + 9:2, cj:cj + 9:2, :]
            for ci in range(5) for cj in range(5)]
    p2 = jnp.stack(wins, axis=3).reshape(Bp, 25, 400)       # (b, pos, cell*16+c)
    p2 = (p2.reshape(nb, BT, 25, 400)
            .transpose(0, 2, 1, 3)                          # (nb, 25, BT, 400)
            .reshape(nb * 25 * BT, 400))                    # row = (n, p, b)

    logits_pad = pl.pallas_call(
        _conv2_fc_kernel,
        out_shape=jax.ShapeDtypeStruct((Bp, 128), jnp.float32),
        grid=(nb,),
        in_specs=[
            pl.BlockSpec((25 * BT, 400), lambda i: (i, 0)),
            pl.BlockSpec((400, 128), lambda i: (0, 0)),     # weights resident
            pl.BlockSpec((1, 128), lambda i: (0, 0)),
            pl.BlockSpec((800, 128), lambda i: (0, 0)),
            pl.BlockSpec((1, 128), lambda i: (0, 0)),
            pl.BlockSpec((128, 128), lambda i: (0, 0)),
            pl.BlockSpec((1, 128), lambda i: (0, 0)),
        ],
        out_specs=pl.BlockSpec((BT, 128), lambda i: (i, 0)),
        scratch_shapes=[pltpu.VMEM((BT, 800), jnp.float32)],
        compiler_params=pltpu.CompilerParams(
            dimension_semantics=("parallel",)),
    )(p2, kp["w2e"], kp["b2e"], kp["wfc1"], kp["bfc1"],
      kp["wfc2"], kp["bfc2"])

    return logits_pad[:B, :10]


# ----------------------------------------------------------------------------
# Init (PyTorch default-init layout) + pure-JAX f32 reference
# ----------------------------------------------------------------------------
def init_params(key):
    def uni(k, shape, bound):
        return jax.random.uniform(k, shape, jnp.float32, -bound, bound)
    k = jax.random.split(key, 8)
    bconv1 = 1.0 / (1 * 3 * 3) ** 0.5
    bconv2 = 1.0 / (16 * 4 * 4) ** 0.5
    bfc1 = 1.0 / 800 ** 0.5
    bfc2 = 1.0 / 100 ** 0.5
    wc1 = uni(k[0], (16, 1, 3, 3), bconv1); bc1 = uni(k[1], (16,), bconv1)
    wc2 = uni(k[2], (32, 16, 4, 4), bconv2); bc2 = uni(k[3], (32,), bconv2)
    w1 = uni(k[4], (100, 800), bfc1); b1 = uni(k[5], (100,), bfc1)
    w2 = uni(k[6], (10, 100), bfc2); b2 = uni(k[7], (10,), bfc2)
    return ((wc1, bc1), (wc2, bc2), (w1, b1), (w2, b2))


def reference_forward(x, params):
    """Pure-JAX f32 replica of the PyTorch CNN_MNIST forward."""
    (wc1, bc1), (wc2, bc2), (w1, b1), (w2, b2) = params
    dn = ("NCHW", "OIHW", "NCHW")
    y = jax.lax.conv_general_dilated(x, wc1, (1, 1), "VALID",
                                     dimension_numbers=dn)
    y = jnp.maximum(y + bc1[None, :, None, None], 0.0)
    y = jax.lax.reduce_window(y, -jnp.inf, jax.lax.max,
                              (1, 1, 2, 2), (1, 1, 2, 2), "VALID")
    y = jax.lax.conv_general_dilated(y, wc2, (1, 1), "VALID",
                                     dimension_numbers=dn)
    y = jnp.maximum(y + bc2[None, :, None, None], 0.0)
    y = jax.lax.reduce_window(y, -jnp.inf, jax.lax.max,
                              (1, 1, 2, 2), (1, 1, 2, 2), "VALID")
    f = y.reshape(y.shape[0], -1)                   # PyTorch (c, h, w) order
    z = jnp.maximum(f @ w1.T + b1, 0.0)
    return z @ w2.T + b2


if __name__ == "__main__":
    key = jax.random.PRNGKey(0)
    key, kx = jax.random.split(key)
    params = init_params(key)
    kparams = prepare_kernel_params(params)

    # Primary check: small batch (padded to one BT=8 tile).
    x = jax.random.normal(kx, (2, 1, 28, 28), dtype=jnp.float32)
    out = jax.block_until_ready(cnn_mnist_forward(x, kparams))
    ref = reference_forward(x, params)
    assert out.shape == (2, 10), out.shape
    err = float(jnp.max(jnp.abs(out - ref)))
    assert err < 5e-2, f"max abs diff {err}"          # bf16 MXU operands

    # Secondary check: multi-step grid + batch-padding path (B=19, BT=8 -> 3 steps).
    x2 = jax.random.normal(jax.random.PRNGKey(1), (19, 1, 28, 28), jnp.float32)
    out2 = jax.block_until_ready(cnn_mnist_forward(x2, kparams, block_batch=8))
    ref2 = reference_forward(x2, params)
    err2 = float(jnp.max(jnp.abs(out2 - ref2)))
    assert out2.shape == (19, 10), out2.shape
    assert err2 < 5e-2, f"max abs diff {err2}"

    print("KERNEL_OK")
</pallas_src>

<mosaic_0001>
module attributes {stable_mosaic.version = 11 : i64} {
  func.func @_conv1_pool_kernel(%arg0: i32, %arg1: memref<1x16x1352xbf16, #tpu.memory_space<vmem>>, %arg2: memref<64x16xbf16, #tpu.memory_space<vmem>>, %arg3: memref<64x1xf32, #tpu.memory_space<vmem>>, %arg4: memref<1x16x1352xbf16, #tpu.memory_space<vmem>>) attributes {dimension_semantics = [#tpu.dimension_semantics<parallel>], iteration_bounds = array<i64: 1>, scalar_prefetch = 0 : i64, scratch_operands = 0 : i64, tpu.core_type = #tpu.core_type<tc>, window_params = [{transform_indices = @transform_0, window_bounds = array<i64: 1, 16, 1352>}, {pipeline_mode = #tpu.pipeline_mode<synchronous>, transform_indices = @transform_1, window_bounds = array<i64: 64, 16>}, {pipeline_mode = #tpu.pipeline_mode<synchronous>, transform_indices = @transform_2, window_bounds = array<i64: 64, 1>}, {transform_indices = @transform_3, window_bounds = array<i64: 1, 16, 1352>}]} {
    %c0 = arith.constant 0 : index
    %c0_0 = arith.constant 0 : index
    %c0_1 = arith.constant 0 : index
    %0 = vector.load %arg1[%c0, %c0_0, %c0_1] : memref<1x16x1352xbf16, #tpu.memory_space<vmem>>, vector<1x16x1352xbf16>
    %1 = vector.shape_cast %0 : vector<1x16x1352xbf16> to vector<16x1352xbf16>
    %c0_2 = arith.constant 0 : index
    %c0_3 = arith.constant 0 : index
    %2 = vector.load %arg2[%c0_2, %c0_3] : memref<64x16xbf16, #tpu.memory_space<vmem>>, vector<64x16xbf16>
    %cst = arith.constant dense<0.000000e+00> : vector<64x1352xf32>
    %3 = tpu.matmul %2, %1, %cst {dimension_numbers = #tpu.dot_dimension_numbers<[1], [0], [0], [1], [0, 0, 1, 1], [], []>} : vector<64x16xbf16>, vector<16x1352xbf16>, vector<64x1352xf32> -> vector<64x1352xf32>
    %c0_4 = arith.constant 0 : index
    %c0_5 = arith.constant 0 : index
    %4 = vector.load %arg3[%c0_4, %c0_5] : memref<64x1xf32, #tpu.memory_space<vmem>>, vector<64x1xf32>
    %5 = vector.broadcast %4 : vector<64x1xf32> to vector<64x1352xf32>
    %6 = arith.addf %3, %5 : vector<64x1352xf32>
    %cst_6 = arith.constant 0.000000e+00 : f32
    %7 = vector.broadcast %cst_6 : f32 to vector<64x1352xf32>
    %8 = arith.maximumf %6, %7 : vector<64x1352xf32>
    %9 = vector.extract_strided_slice %8 {offsets = [0, 0], sizes = [16, 1352], strides = [1, 1]} : vector<64x1352xf32> to vector<16x1352xf32>
    %10 = vector.extract_strided_slice %8 {offsets = [16, 0], sizes = [16, 1352], strides = [1, 1]} : vector<64x1352xf32> to vector<16x1352xf32>
    %11 = arith.maximumf %9, %10 : vector<16x1352xf32>
    %12 = vector.extract_strided_slice %8 {offsets = [32, 0], sizes = [16, 1352], strides = [1, 1]} : vector<64x1352xf32> to vector<16x1352xf32>
    %13 = vector.extract_strided_slice %8 {offsets = [48, 0], sizes = [16, 1352], strides = [1, 1]} : vector<64x1352xf32> to vector<16x1352xf32>
    %14 = arith.maximumf %12, %13 : vector<16x1352xf32>
    %15 = arith.maximumf %11, %14 : vector<16x1352xf32>
    %16 = arith.truncf %15 : vector<16x1352xf32> to vector<16x1352xbf16>
    %c0_7 = arith.constant 0 : index
    %c0_8 = arith.constant 0 : index
    %c0_9 = arith.constant 0 : index
    %17 = vector.load %arg4[%c0_7, %c0_8, %c0_9] : memref<1x16x1352xbf16, #tpu.memory_space<vmem>>, vector<1x16x1352xbf16>
    %18 = vector.shape_cast %17 : vector<1x16x1352xbf16> to vector<16x1352xbf16>
    %19 = vector.shape_cast %16 : vector<16x1352xbf16> to vector<1x16x1352xbf16>
    tpu.vector_store %arg4[%c0_7, %c0_8, %c0_9], %19 {strides = array<i32>} : memref<1x16x1352xbf16, #tpu.memory_space<vmem>>, vector<1x16x1352xbf16>,
    return
  }
  func.func @transform_0(%arg0: i32) -> (i32, i32, i32) {
    %c0_i32 = arith.constant 0 : i32
    %c0_i32_0 = arith.constant 0 : i32
    %c0_i32_1 = arith.constant 0 : i32
    return %arg0, %c0_i32, %c0_i32_0 : i32, i32, i32
  }
  func.func @transform_1(%arg0: i32) -> (i32, i32) {
    %c0_i32 = arith.constant 0 : i32
    %c0_i32_0 = arith.constant 0 : i32
    %c0_i32_1 = arith.constant 0 : i32
    return %c0_i32, %c0_i32_0 : i32, i32
  }
  func.func @transform_2(%arg0: i32) -> (i32, i32) {
    %c0_i32 = arith.constant 0 : i32
    %c0_i32_0 = arith.constant 0 : i32
    %c0_i32_1 = arith.constant 0 : i32
    return %c0_i32, %c0_i32_0 : i32, i32
  }
  func.func @transform_3(%arg0: i32) -> (i32, i32, i32) {
    %c0_i32 = arith.constant 0 : i32
    %c0_i32_0 = arith.constant 0 : i32
    %c0_i32_1 = arith.constant 0 : i32
    return %arg0, %c0_i32, %c0_i32_0 : i32, i32, i32
  }
}

module attributes {stable_mosaic.version = 11 : i64} {
  func.func @_conv2_fc_kernel(%arg0: i32, %arg1: memref<200x400xbf16, #tpu.memory_space<vmem>>, %arg2: memref<400x128xbf16, #tpu.memory_space<vmem>>, %arg3: memref<1x128xf32, #tpu.memory_space<vmem>>, %arg4: memref<800x128xbf16, #tpu.memory_space<vmem>>, %arg5: memref<1x128xf32, #tpu.memory_space<vmem>>, %arg6: memref<128x128xbf16, #tpu.memory_space<vmem>>, %arg7: memref<1x128xf32, #tpu.memory_space<vmem>>, %arg8: memref<8x128xf32, #tpu.memory_space<vmem>>, %arg9: memref<8x800xf32, #tpu.memory_space<vmem>>) attributes {dimension_semantics = [#tpu.dimension_semantics<parallel>], iteration_bounds = array<i64: 1>, scalar_prefetch = 0 : i64, scratch_operands = 1 : i64, tpu.core_type = #tpu.core_type<tc>, window_params = [{transform_indices = @transform_0, window_bounds = array<i64: 200, 400>}, {pipeline_mode = #tpu.pipeline_mode<synchronous>, transform_indices = @transform_1, window_bounds = array<i64: 400, 128>}, {pipeline_mode = #tpu.pipeline_mode<synchronous>, transform_indices = @transform_2, window_bounds = array<i64: 1, 128>}, {pipeline_mode = #tpu.pipeline_mode<synchronous>, transform_indices = @transform_3, window_bounds = array<i64: 800, 128>}, {pipeline_mode = #tpu.pipeline_mode<synchronous>, transform_indices = @transform_4, window_bounds = array<i64: 1, 128>}, {pipeline_mode = #tpu.pipeline_mode<synchronous>, transform_indices = @transform_5, window_bounds = array<i64: 128, 128>}, {pipeline_mode = #tpu.pipeline_mode<synchronous>, transform_indices = @transform_6, window_bounds = array<i64: 1, 128>}, {transform_indices = @transform_7, window_bounds = array<i64: 8, 128>}]} {
    %c0 = arith.constant 0 : index
    %c0_0 = arith.constant 0 : index
    %0 = vector.load %arg1[%c0, %c0_0] : memref<200x400xbf16, #tpu.memory_space<vmem>>, vector<200x400xbf16>
    %c0_1 = arith.constant 0 : index
    %c0_2 = arith.constant 0 : index
    %1 = vector.load %arg2[%c0_1, %c0_2] : memref<400x128xbf16, #tpu.memory_space<vmem>>, vector<400x128xbf16>
    %cst = arith.constant dense<0.000000e+00> : vector<200x128xf32>
    %2 = tpu.matmul %0, %1, %cst {dimension_numbers = #tpu.dot_dimension_numbers<[1], [0], [0], [1], [0, 0, 1, 1], [], []>} : vector<200x400xbf16>, vector<400x128xbf16>, vector<200x128xf32> -> vector<200x128xf32>
    %c0_3 = arith.constant 0 : index
    %c0_4 = arith.constant 0 : index
    %3 = vector.load %arg3[%c0_3, %c0_4] : memref<1x128xf32, #tpu.memory_space<vmem>>, vector<1x128xf32>
    %4 = vector.broadcast %3 : vector<1x128xf32> to vector<200x128xf32>
    %5 = arith.addf %2, %4 : vector<200x128xf32>
    %cst_5 = arith.constant 0.000000e+00 : f32
    %6 = vector.broadcast %cst_5 : f32 to vector<200x128xf32>
    %7 = arith.maximumf %5, %6 : vector<200x128xf32>
    %8 = vector.extract_strided_slice %7 {offsets = [0, 0], sizes = [200, 32], strides = [1, 1]} : vector<200x128xf32> to vector<200x32xf32>
    %9 = vector.extract_strided_slice %7 {offsets = [0, 32], sizes = [200, 32], strides = [1, 1]} : vector<200x128xf32> to vector<200x32xf32>
    %10 = arith.maximumf %8, %9 : vector<200x32xf32>
    %11 = vector.extract_strided_slice %7 {offsets = [0, 64], sizes = [200, 32], strides = [1, 1]} : vector<200x128xf32> to vector<200x32xf32>
    %12 = vector.extract_strided_slice %7 {offsets = [0, 96], sizes = [200, 32], strides = [1, 1]} : vector<200x128xf32> to vector<200x32xf32>
    %13 = arith.maximumf %11, %12 : vector<200x32xf32>
    %14 = arith.maximumf %10, %13 : vector<200x32xf32>
    %15 = vector.extract_strided_slice %14 {offsets = [0, 0], sizes = [8, 32], strides = [1, 1]} : vector<200x32xf32> to vector<8x32xf32>
    %c0_6 = arith.constant 0 : index
    %c0_7 = arith.constant 0 : index
    %16 = vector.load %arg9[%c0_6, %c0_7] : memref<8x800xf32, #tpu.memory_space<vmem>>, vector<8x32xf32>
    tpu.vector_store %arg9[%c0_6, %c0_7], %15 {strides = array<i32>} : memref<8x800xf32, #tpu.memory_space<vmem>>, vector<8x32xf32>,
    %17 = vector.extract_strided_slice %14 {offsets = [8, 0], sizes = [8, 32], strides = [1, 1]} : vector<200x32xf32> to vector<8x32xf32>
    %c0_8 = arith.constant 0 : index
    %c32 = arith.constant 32 : index
    %18 = vector.load %arg9[%c0_8, %c32] : memref<8x800xf32, #tpu.memory_space<vmem>>, vector<8x32xf32>
    tpu.vector_store %arg9[%c0_8, %c32], %17 {strides = array<i32>} : memref<8x800xf32, #tpu.memory_space<vmem>>, vector<8x32xf32>,
    %19 = vector.extract_strided_slice %14 {offsets = [16, 0], sizes = [8, 32], strides = [1, 1]} : vector<200x32xf32> to vector<8x32xf32>
    %c0_9 = arith.constant 0 : index
    %c64 = arith.constant 64 : index
    %20 = vector.load %arg9[%c0_9, %c64] : memref<8x800xf32, #tpu.memory_space<vmem>>, vector<8x32xf32>
    tpu.vector_store %arg9[%c0_9, %c64], %19 {strides = array<i32>} : memref<8x800xf32, #tpu.memory_space<vmem>>, vector<8x32xf32>,
    %21 = vector.extract_strided_slice %14 {offsets = [24, 0], sizes = [8, 32], strides = [1, 1]} : vector<200x32xf32> to vector<8x32xf32>
    %c0_10 = arith.constant 0 : index
    %c96 = arith.constant 96 : index
    %22 = vector.load %arg9[%c0_10, %c96] : memref<8x800xf32, #tpu.memory_space<vmem>>, vector<8x32xf32>
    tpu.vector_store %arg9[%c0_10, %c96], %21 {strides = array<i32>} : memref<8x800xf32, #tpu.memory_space<vmem>>, vector<8x32xf32>,
    %23 = vector.extract_strided_slice %14 {offsets = [32, 0], sizes = [8, 32], strides = [1, 1]} : vector<200x32xf32> to vector<8x32xf32>
    %c0_11 = arith.constant 0 : index
    %c128 = arith.constant 128 : index
    %24 = vector.load %arg9[%c0_11, %c128] : memref<8x800xf32, #tpu.memory_space<vmem>>, vector<8x32xf32>
    tpu.vector_store %arg9[%c0_11, %c128], %23 {strides = array<i32>} : memref<8x800xf32, #tpu.memory_space<vmem>>, vector<8x32xf32>,
    %25 = vector.extract_strided_slice %14 {offsets = [40, 0], sizes = [8, 32], strides = [1, 1]} : vector<200x32xf32> to vector<8x32xf32>
    %c0_12 = arith.constant 0 : index
    %c160 = arith.constant 160 : index
    %26 = vector.load %arg9[%c0_12, %c160] : memref<8x800xf32, #tpu.memory_space<vmem>>, vector<8x32xf32>
    tpu.vector_store %arg9[%c0_12, %c160], %25 {strides = array<i32>} : memref<8x800xf32, #tpu.memory_space<vmem>>, vector<8x32xf32>,
    %27 = vector.extract_strided_slice %14 {offsets = [48, 0], sizes = [8, 32], strides = [1, 1]} : vector<200x32xf32> to vector<8x32xf32>
    %c0_13 = arith.constant 0 : index
    %c192 = arith.constant 192 : index
    %28 = vector.load %arg9[%c0_13, %c192] : memref<8x800xf32, #tpu.memory_space<vmem>>, vector<8x32xf32>
    tpu.vector_store %arg9[%c0_13, %c192], %27 {strides = array<i32>} : memref<8x800xf32, #tpu.memory_space<vmem>>, vector<8x32xf32>,
    %29 = vector.extract_strided_slice %14 {offsets = [56, 0], sizes = [8, 32], strides = [1, 1]} : vector<200x32xf32> to vector<8x32xf32>
    %c0_14 = arith.constant 0 : index
    %c224 = arith.constant 224 : index
    %30 = vector.load %arg9[%c0_14, %c224] : memref<8x800xf32, #tpu.memory_space<vmem>>, vector<8x32xf32>
    tpu.vector_store %arg9[%c0_14, %c224], %29 {strides = array<i32>} : memref<8x800xf32, #tpu.memory_space<vmem>>, vector<8x32xf32>,
    %31 = vector.extract_strided_slice %14 {offsets = [64, 0], sizes = [8, 32], strides = [1, 1]} : vector<200x32xf32> to vector<8x32xf32>
    %c0_15 = arith.constant 0 : index
    %c256 = arith.constant 256 : index
    %32 = vector.load %arg9[%c0_15, %c256] : memref<8x800xf32, #tpu.memory_space<vmem>>, vector<8x32xf32>
    tpu.vector_store %arg9[%c0_15, %c256], %31 {strides = array<i32>} : memref<8x800xf32, #tpu.memory_space<vmem>>, vector<8x32xf32>,
    %33 = vector.extract_strided_slice %14 {offsets = [72, 0], sizes = [8, 32], strides = [1, 1]} : vector<200x32xf32> to vector<8x32xf32>
    %c0_16 = arith.constant 0 : index
    %c288 = arith.constant 288 : index
    %34 = vector.load %arg9[%c0_16, %c288] : memref<8x800xf32, #tpu.memory_space<vmem>>, vector<8x32xf32>
    tpu.vector_store %arg9[%c0_16, %c288], %33 {strides = array<i32>} : memref<8x800xf32, #tpu.memory_space<vmem>>, vector<8x32xf32>,
    %35 = vector.extract_strided_slice %14 {offsets = [80, 0], sizes = [8, 32], strides = [1, 1]} : vector<200x32xf32> to vector<8x32xf32>
    %c0_17 = arith.constant 0 : index
    %c320 = arith.constant 320 : index
    %36 = vector.load %arg9[%c0_17, %c320] : memref<8x800xf32, #tpu.memory_space<vmem>>, vector<8x32xf32>
    tpu.vector_store %arg9[%c0_17, %c320], %35 {strides = array<i32>} : memref<8x800xf32, #tpu.memory_space<vmem>>, vector<8x32xf32>,
    %37 = vector.extract_strided_slice %14 {offsets = [88, 0], sizes = [8, 32], strides = [1, 1]} : vector<200x32xf32> to vector<8x32xf32>
    %c0_18 = arith.constant 0 : index
    %c352 = arith.constant 352 : index
    %38 = vector.load %arg9[%c0_18, %c352] : memref<8x800xf32, #tpu.memory_space<vmem>>, vector<8x32xf32>
    tpu.vector_store %arg9[%c0_18, %c352], %37 {strides = array<i32>} : memref<8x800xf32, #tpu.memory_space<vmem>>, vector<8x32xf32>,
    %39 = vector.extract_strided_slice %14 {offsets = [96, 0], sizes = [8, 32], strides = [1, 1]} : vector<200x32xf32> to vector<8x32xf32>
    %c0_19 = arith.constant 0 : index
    %c384 = arith.constant 384 : index
    %40 = vector.load %arg9[%c0_19, %c384] : memref<8x800xf32, #tpu.memory_space<vmem>>, vector<8x32xf32>
    tpu.vector_store %arg9[%c0_19, %c384], %39 {strides = array<i32>} : memref<8x800xf32, #tpu.memory_space<vmem>>, vector<8x32xf32>,
    %41 = vector.extract_strided_slice %14 {offsets = [104, 0], sizes = [8, 32], strides = [1, 1]} : vector<200x32xf32> to vector<8x32xf32>
    %c0_20 = arith.constant 0 : index
    %c416 = arith.constant 416 : index
    %42 = vector.load %arg9[%c0_20, %c416] : memref<8x800xf32, #tpu.memory_space<vmem>>, vector<8x32xf32>
    tpu.vector_store %arg9[%c0_20, %c416], %41 {strides = array<i32>} : memref<8x800xf32, #tpu.memory_space<vmem>>, vector<8x32xf32>,
    %43 = vector.extract_strided_slice %14 {offsets = [112, 0], sizes = [8, 32], strides = [1, 1]} : vector<200x32xf32> to vector<8x32xf32>
    %c0_21 = arith.constant 0 : index
    %c448 = arith.constant 448 : index
    %44 = vector.load %arg9[%c0_21, %c448] : memref<8x800xf32, #tpu.memory_space<vmem>>, vector<8x32xf32>
    tpu.vector_store %arg9[%c0_21, %c448], %43 {strides = array<i32>} : memref<8x800xf32, #tpu.memory_space<vmem>>, vector<8x32xf32>,
    %45 = vector.extract_strided_slice %14 {offsets = [120, 0], sizes = [8, 32], strides = [1, 1]} : vector<200x32xf32> to vector<8x32xf32>
    %c0_22 = arith.constant 0 : index
    %c480 = arith.constant 480 : index
    %46 = vector.load %arg9[%c0_22, %c480] : memref<8x800xf32, #tpu.memory_space<vmem>>, vector<8x32xf32>
    tpu.vector_store %arg9[%c0_22, %c480], %45 {strides = array<i32>} : memref<8x800xf32, #tpu.memory_space<vmem>>, vector<8x32xf32>,
    %47 = vector.extract_strided_slice %14 {offsets = [128, 0], sizes = [8, 32], strides = [1, 1]} : vector<200x32xf32> to vector<8x32xf32>
    %c0_23 = arith.constant 0 : index
    %c512 = arith.constant 512 : index
    %48 = vector.load %arg9[%c0_23, %c512] : memref<8x800xf32, #tpu.memory_space<vmem>>, vector<8x32xf32>
    tpu.vector_store %arg9[%c0_23, %c512], %47 {strides = array<i32>} : memref<8x800xf32, #tpu.memory_space<vmem>>, vector<8x32xf32>,
    %49 = vector.extract_strided_slice %14 {offsets = [136, 0], sizes = [8, 32], strides = [1, 1]} : vector<200x32xf32> to vector<8x32xf32>
    %c0_24 = arith.constant 0 : index
    %c544 = arith.constant 544 : index
    %50 = vector.load %arg9[%c0_24, %c544] : memref<8x800xf32, #tpu.memory_space<vmem>>, vector<8x32xf32>
    tpu.vector_store %arg9[%c0_24, %c544], %49 {strides = array<i32>} : memref<8x800xf32, #tpu.memory_space<vmem>>, vector<8x32xf32>,
    %51 = vector.extract_strided_slice %14 {offsets = [144, 0], sizes = [8, 32], strides = [1, 1]} : vector<200x32xf32> to vector<8x32xf32>
    %c0_25 = arith.constant 0 : index
    %c576 = arith.constant 576 : index
    %52 = vector.load %arg9[%c0_25, %c576] : memref<8x800xf32, #tpu.memory_space<vmem>>, vector<8x32xf32>
    tpu.vector_store %arg9[%c0_25, %c576], %51 {strides = array<i32>} : memref<8x800xf32, #tpu.memory_space<vmem>>, vector<8x32xf32>,
    %53 = vector.extract_strided_slice %14 {offsets = [152, 0], sizes = [8, 32], strides = [1, 1]} : vector<200x32xf32> to vector<8x32xf32>
    %c0_26 = arith.constant 0 : index
    %c608 = arith.constant 608 : index
    %54 = vector.load %arg9[%c0_26, %c608] : memref<8x800xf32, #tpu.memory_space<vmem>>, vector<8x32xf32>
    tpu.vector_store %arg9[%c0_26, %c608], %53 {strides = array<i32>} : memref<8x800xf32, #tpu.memory_space<vmem>>, vector<8x32xf32>,
    %55 = vector.extract_strided_slice %14 {offsets = [160, 0], sizes = [8, 32], strides = [1, 1]} : vector<200x32xf32> to vector<8x32xf32>
    %c0_27 = arith.constant 0 : index
    %c640 = arith.constant 640 : index
    %56 = vector.load %arg9[%c0_27, %c640] : memref<8x800xf32, #tpu.memory_space<vmem>>, vector<8x32xf32>
    tpu.vector_store %arg9[%c0_27, %c640], %55 {strides = array<i32>} : memref<8x800xf32, #tpu.memory_space<vmem>>, vector<8x32xf32>,
    %57 = vector.extract_strided_slice %14 {offsets = [168, 0], sizes = [8, 32], strides = [1, 1]} : vector<200x32xf32> to vector<8x32xf32>
    %c0_28 = arith.constant 0 : index
    %c672 = arith.constant 672 : index
    %58 = vector.load %arg9[%c0_28, %c672] : memref<8x800xf32, #tpu.memory_space<vmem>>, vector<8x32xf32>
    tpu.vector_store %arg9[%c0_28, %c672], %57 {strides = array<i32>} : memref<8x800xf32, #tpu.memory_space<vmem>>, vector<8x32xf32>,
    %59 = vector.extract_strided_slice %14 {offsets = [176, 0], sizes = [8, 32], strides = [1, 1]} : vector<200x32xf32> to vector<8x32xf32>
    %c0_29 = arith.constant 0 : index
    %c704 = arith.constant 704 : index
    %60 = vector.load %arg9[%c0_29, %c704] : memref<8x800xf32, #tpu.memory_space<vmem>>, vector<8x32xf32>
    tpu.vector_store %arg9[%c0_29, %c704], %59 {strides = array<i32>} : memref<8x800xf32, #tpu.memory_space<vmem>>, vector<8x32xf32>,
    %61 = vector.extract_strided_slice %14 {offsets = [184, 0], sizes = [8, 32], strides = [1, 1]} : vector<200x32xf32> to vector<8x32xf32>
    %c0_30 = arith.constant 0 : index
    %c736 = arith.constant 736 : index
    %62 = vector.load %arg9[%c0_30, %c736] : memref<8x800xf32, #tpu.memory_space<vmem>>, vector<8x32xf32>
    tpu.vector_store %arg9[%c0_30, %c736], %61 {strides = array<i32>} : memref<8x800xf32, #tpu.memory_space<vmem>>, vector<8x32xf32>,
    %63 = vector.extract_strided_slice %14 {offsets = [192, 0], sizes = [8, 32], strides = [1, 1]} : vector<200x32xf32> to vector<8x32xf32>
    %c0_31 = arith.constant 0 : index
    %c768 = arith.constant 768 : index
    %64 = vector.load %arg9[%c0_31, %c768] : memref<8x800xf32, #tpu.memory_space<vmem>>, vector<8x32xf32>
    tpu.vector_store %arg9[%c0_31, %c768], %63 {strides = array<i32>} : memref<8x800xf32, #tpu.memory_space<vmem>>, vector<8x32xf32>,
    %c0_32 = arith.constant 0 : index
    %c0_33 = arith.constant 0 : index
    %65 = vector.load %arg9[%c0_32, %c0_33] : memref<8x800xf32, #tpu.memory_space<vmem>>, vector<8x800xf32>
    %66 = arith.truncf %65 : vector<8x800xf32> to vector<8x800xbf16>
    %c0_34 = arith.constant 0 : index
    %c0_35 = arith.constant 0 : index
    %67 = vector.load %arg4[%c0_34, %c0_35] : memref<800x128xbf16, #tpu.memory_space<vmem>>, vector<800x128xbf16>
    %cst_36 = arith.constant dense<0.000000e+00> : vector<8x128xf32>
    %68 = tpu.matmul %66, %67, %cst_36 {dimension_numbers = #tpu.dot_dimension_numbers<[1], [0], [0], [1], [0, 0, 1, 1], [], []>} : vector<8x800xbf16>, vector<800x128xbf16>, vector<8x128xf32> -> vector<8x128xf32>
    %c0_37 = arith.constant 0 : index
    %c0_38 = arith.constant 0 : index
    %69 = vector.load %arg5[%c0_37, %c0_38] : memref<1x128xf32, #tpu.memory_space<vmem>>, vector<1x128xf32>
    %70 = vector.broadcast %69 : vector<1x128xf32> to vector<8x128xf32>
    %71 = arith.addf %68, %70 : vector<8x128xf32>
    %cst_39 = arith.constant 0.000000e+00 : f32
    %72 = vector.broadcast %cst_39 : f32 to vector<8x128xf32>
    %73 = arith.maximumf %71, %72 : vector<8x128xf32>
    %74 = arith.truncf %73 : vector<8x128xf32> to vector<8x128xbf16>
    %c0_40 = arith.constant 0 : index
    %c0_41 = arith.constant 0 : index
    %75 = vector.load %arg6[%c0_40, %c0_41] : memref<128x128xbf16, #tpu.memory_space<vmem>>, vector<128x128xbf16>
    %cst_42 = arith.constant dense<0.000000e+00> : vector<8x128xf32>
    %76 = tpu.matmul %74, %75, %cst_42 {dimension_numbers = #tpu.dot_dimension_numbers<[1], [0], [0], [1], [0, 0, 1, 1], [], []>} : vector<8x128xbf16>, vector<128x128xbf16>, vector<8x128xf32> -> vector<8x128xf32>
    %c0_43 = arith.constant 0 : index
    %c0_44 = arith.constant 0 : index
    %77 = vector.load %arg7[%c0_43, %c0_44] : memref<1x128xf32, #tpu.memory_space<vmem>>, vector<1x128xf32>
    %78 = vector.broadcast %77 : vector<1x128xf32> to vector<8x128xf32>
    %79 = arith.addf %76, %78 : vector<8x128xf32>
    %c0_45 = arith.constant 0 : index
    %c0_46 = arith.constant 0 : index
    %80 = vector.load %arg8[%c0_45, %c0_46] : memref<8x128xf32, #tpu.memory_space<vmem>>, vector<8x128xf32>
    tpu.vector_store %arg8[%c0_45, %c0_46], %79 {strides = array<i32>} : memref<8x128xf32, #tpu.memory_space<vmem>>, vector<8x128xf32>,
    return
  }
  func.func @transform_0(%arg0: i32) -> (i32, i32) {
    %c0_i32 = arith.constant 0 : i32
    %c0_i32_0 = arith.constant 0 : i32
    return %arg0, %c0_i32 : i32, i32
  }
  func.func @transform_1(%arg0: i32) -> (i32, i32) {
    %c0_i32 = arith.constant 0 : i32
    %c0_i32_0 = arith.constant 0 : i32
    %c0_i32_1 = arith.constant 0 : i32
    return %c0_i32, %c0_i32_0 : i32, i32
  }
  func.func @transform_2(%arg0: i32) -> (i32, i32) {
    %c0_i32 = arith.constant 0 : i32
    %c0_i32_0 = arith.constant 0 : i32
    %c0_i32_1 = arith.constant 0 : i32
    return %c0_i32, %c0_i32_0 : i32, i32
  }
  func.func @transform_3(%arg0: i32) -> (i32, i32) {
    %c0_i32 = arith.constant 0 : i32
    %c0_i32_0 = arith.constant 0 : i32
    %c0_i32_1 = arith.constant 0 : i32
    return %c0_i32, %c0_i32_0 : i32, i32
  }
  func.func @transform_4(%arg0: i32) -> (i32, i32) {
    %c0_i32 = arith.constant 0 : i32
    %c0_i32_0 = arith.constant 0 : i32
    %c0_i32_1 = arith.constant 0 : i32
    return %c0_i32, %c0_i32_0 : i32, i32
  }
  func.func @transform_5(%arg0: i32) -> (i32, i32) {
    %c0_i32 = arith.constant 0 : i32
    %c0_i32_0 = arith.constant 0 : i32
    %c0_i32_1 = arith.constant 0 : i32
    return %c0_i32, %c0_i32_0 : i32, i32
  }
  func.func @transform_6(%arg0: i32) -> (i32, i32) {
    %c0_i32 = arith.constant 0 : i32
    %c0_i32_0 = arith.constant 0 : i32
    %c0_i32_1 = arith.constant 0 : i32
    return %c0_i32, %c0_i32_0 : i32, i32
  }
  func.func @transform_7(%arg0: i32) -> (i32, i32) {
    %c0_i32 = arith.constant 0 : i32
    %c0_i32_0 = arith.constant 0 : i32
    return %arg0, %c0_i32 : i32, i32
  }
}

</mosaic_0001>

<bundles_post_ra>
// kernel: cnn_mnist_forward.2
= control target key start
LH: loop header
LB: loop body
LE: loop exit
PB: predicated region body
PF: predicated region fallthrough
CT: control target
= control target key end

     0   :  { %v944_v1 = vmov 0   ;;  %vm159_vm0 = vcmask 130048   ;;  %vm829_vm1 = vcmask 584704   ;;  %s1284_s0 = inlined_call_operand.vmem [shape: bf16[1,16,1352], index: 0, kind: input, shape index: {}]   ;;  %s1285_s1 = inlined_call_operand.vmem [shape: bf16[64,16], index: 1, kind: input, shape index: {}]   ;;  %s1286_s2 = inlined_call_operand.vmem [shape: f32[64,1], index: 2, kind: input, shape index: {}]   ;;  %s1287_s3 = inlined_call_operand.vmem [shape: bf16[1,16,1352], index: 3, kind: output, shape index: {}]  }
   0x1   :  { %v924_v0 = vld [vmem:[%s1284_s0 + $0x4] ss:$44 sps:$4 sm:$0xff]   ;;  %204 = vmatprep.mubr.bf16.mxu0 %v944_v1  ;;  %234 = vmatprep.mubr.bf16.mxu1 %v944_v1  ;;  %v926_v2 = vld [vmem:[%s1284_s0] ss:$44 sps:$4 sm:$0xff]   ;;  %v983_v4 = vld [vmem:[%s1285_s1 + $0x18] sm:$0xff]  }
   0x2   :  { %922 = vset.pattern.permute.xlu0 %v944_v1  ;;  %923 = vset.pattern.permute.xlu1 %v944_v1  ;;  %v978_v3 = vld [vmem:[%s1285_s1] sm:$0xff]   ;;  %v929_v5 = vld [vmem:[%s1284_s0 + $0x8] ss:$44 sps:$4 sm:$0xff]   ;;  %v931_v6 = vld [vmem:[%s1284_s0 + $0xc] ss:$44 sps:$4 sm:$0xff]  }
   0x3   :  { %172 = vmatprep.subr.bf16.mxu0 %v924_v0  ;;  %919 = vmatprep.subr.bf16.mxu1 %v924_v0  ;;  %v932_v7 = vld [vmem:[%s1284_s0 + $0x10] ss:$44 sps:$4 sm:$0xff]   ;;  %v934_v8 = vld [vmem:[%s1284_s0 + $0x14] ss:$44 sps:$4 sm:$0xff]   ;;  %v935_v10 = vld [vmem:[%s1285_s1 + $0x8] sm:$0xff]  }
   0x4   :  { %173 = vmatpush1.bf16.msra.mxu0 %v926_v2  ;;  %920 = vmatpush1.bf16.msra.mxu1 %v926_v2  ;;  %v938_v9 = vld [vmem:[%s1284_s0 + $0x1c] ss:$44 sps:$4 sm:$0xff]   ;;  %v942_v11 = vld [vmem:[%s1284_s0 + $0x24] ss:$44 sps:$4 sm:$0xff]   ;;  %v940_v23 = vld [vmem:[%s1284_s0 + $0x20] ss:$44 sps:$4 sm:$0xff]  }
   0x5   :  { %245 = vmatprep.subr.bf16.mxu1 %v931_v6  ;;  %318 = vmatprep.subr.bf16.mxu0 %v934_v8  ;;  %v936_v12 = vld [vmem:[%s1284_s0 + $0x18] ss:$44 sps:$4 sm:$0xff]   ;;  %v943_v14 = vld [vmem:[%s1284_s0 + $0x28] ss:$44 sps:$4 sm:$0xff]  }
   0x6   :  { %v35_v13 = vld [vmem:[%s1286_s2] sm:$0xff]  ;;  %v37_v15 = vld [vmem:[%s1286_s2 + $0x10] sm:$0xff]  ;;  %v36_v16 = vld [vmem:[%s1286_s2 + $0x8] sm:$0xff] }
   0x7   :  { %856 = vmatmul.mubr.msk.bf16.vlgmr.msra.gmra.mrb[0].mxu0 %vm159_vm0, %v978_v3  ;;  %859 = vmatmul.mubr.msk.bf16.vlgmr.msra.gmra.mrb[0].mxu1 %vm159_vm0, %v983_v4  ;;  %v38_v17 = vld [vmem:[%s1286_s2 + $0x18] sm:$0xff]  ;;  %v939_v18 = vld [vmem:[%s1285_s1 + $0x10] sm:$0xff]   ;;  %v39_v19 = vld [vmem:[%s1286_s2 + $0x20] sm:$0xff] }
   0x8   :  { %246 = vmatpush1.bf16.msra.mxu1 %v929_v5  ;;  %319 = vmatpush1.bf16.msra.mxu0 %v932_v7  ;;  %v40_v20 = vld [vmem:[%s1286_s2 + $0x28] sm:$0xff]  ;;  %v41_v21 = vld [vmem:[%s1286_s2 + $0x30] sm:$0xff]  ;;  %v42_v22 = vld [vmem:[%s1286_s2 + $0x38] sm:$0xff] }
   0x9   :  { %214 = vmatprep.mubr.bf16.mxu0 %v944_v1  ;;  %277 = vmatprep.mubr.bf16.mxu1 %v944_v1 }
   0xa   :  { %391 = vmatprep.subr.bf16.mxu1 %v938_v9  ;;  %464 = vmatprep.subr.bf16.mxu0 %v942_v11 }
   0xb   :  { %45 = vperm.xlu0 %922, %v35_v13   ;;  %55 = vperm.xlu1 %923, %v37_v15  }
   0xf   :  { %857 = vmatmul.mubr.msk.bf16.gmra.mrb[4].mxu0 %vm159_vm0, %v935_v10  ;;  %860 = vmatmul.mubr.msk.bf16.vlgmr.msra.gmra.mrb[4].mxu1 %vm159_vm0, %v978_v3 }
  0x10   :  { %392 = vmatpush1.bf16.msra.mxu1 %v936_v12  ;;  %224 = vmatprep.mubr.bf16.mxu0 %v944_v1 }
  0x11   :  { %287 = vmatprep.mubr.bf16.mxu1 %v944_v1  ;;  %909 = vmatprep.subr.bf16.mxu1 %v943_v14 }
  0x12   :  { %50 = vperm.xlu0 %922, %v36_v16   ;;  %60 = vperm.xlu1 %923, %v38_v17  }
  0x16   :  { %65 = vperm.xlu0 %922, %v39_v19   ;;  %70 = vperm.xlu1 %923, %v40_v20  }
  0x17   :  { %858 = vmatmul.mubr.msk.bf16.gmra.mrb[8].mxu0 %vm159_vm0, %v939_v18  ;;  %861 = vmatmul.mubr.msk.bf16.gmra.mrb[8].mxu1 %vm159_vm0, %v935_v10 }
  0x18   :  { %297 = vmatprep.mubr.bf16.mxu1 %v944_v1  ;;  %350 = vmatprep.mubr.bf16.mxu0 %v944_v1 }
  0x1a   :  { %75 = vperm.xlu0 %922, %v41_v21   ;;  %80 = vperm.xlu1 %923, %v42_v22  }
  0x1f   :  { %862 = vmatmul.mubr.msk.bf16.gmra.mrb[12].mxu1 %vm159_vm0, %v939_v18  ;;  %864 = vmatmul.mubr.msk.bf16.vlgmr.msra.gmra.mrb[12].mxu0 %vm159_vm0, %v978_v3 }
  0x20   :  { %465 = vmatpush1.bf16.msra.mxu0 %v940_v23  ;;  %307 = vmatprep.mubr.bf16.mxu1 %v944_v1 }
  0x21   :  { %360 = vmatprep.mubr.bf16.mxu0 %v944_v1 }
  0x27   :  { %863 = vmatmul.mubr.msk.bf16.gmra.mrb[16].mxu1 %vm159_vm0, %v983_v4  ;;  %865 = vmatmul.mubr.msk.bf16.gmra.mrb[16].mxu0 %vm159_vm0, %v935_v10 }
  0x28   :  { %370 = vmatprep.mubr.bf16.mxu0 %v944_v1  ;;  %423 = vmatprep.mubr.bf16.mxu1 %v944_v1 }
  0x2f   :  { %866 = vmatmul.mubr.msk.bf16.gmra.mrb[20].mxu0 %vm159_vm0, %v939_v18  ;;  %868 = vmatmul.mubr.msk.bf16.vlgmr.msra.gmra.mrb[20].mxu1 %vm159_vm0, %v978_v3 }
  0x30   :  { %910 = vmatpush3.bf16.msra.mxu1 %v943_v14  ;;  %380 = vmatprep.mubr.bf16.mxu0 %v944_v1 }
  0x31   :  { %433 = vmatprep.mubr.bf16.mxu1 %v944_v1 }
  0x37   :  { %867 = vmatmul.mubr.msk.bf16.gmra.mrb[24].mxu0 %vm159_vm0, %v983_v4  ;;  %869 = vmatmul.mubr.msk.bf16.gmra.mrb[24].mxu1 %vm159_vm0, %v935_v10 }
  0x38   :  { %443 = vmatprep.mubr.bf16.mxu1 %v944_v1  ;;  %496 = vmatprep.mubr.bf16.mxu0 %v944_v1 }
  0x3f   :  { %870 = vmatmul.mubr.msk.bf16.gmra.mrb[28].mxu1 %vm159_vm0, %v939_v18  ;;  %872 = vmatmul.mubr.msk.bf16.vlgmr.msra.gmra.mrb[28].mxu0 %vm159_vm0, %v978_v3 }
  0x40   :  { %453 = vmatprep.mubr.bf16.mxu1 %v944_v1  ;;  %506 = vmatprep.mubr.bf16.mxu0 %v944_v1 }
  0x47   :  { %871 = vmatmul.mubr.msk.bf16.gmra.mrb[32].mxu1 %vm159_vm0, %v983_v4  ;;  %873 = vmatmul.mubr.msk.bf16.gmra.mrb[32].mxu0 %vm159_vm0, %v935_v10 }
  0x48   :  { %516 = vmatprep.mubr.bf16.mxu0 %v944_v1  ;;  %911 = vmatprep.mubr.msk.bf16.mxu1 %vm159_vm0, %v978_v3 }
  0x4f   :  { %874 = vmatmul.mubr.msk.bf16.gmra.mrb[36].mxu0 %vm159_vm0, %v939_v18  ;;  %912 = vmatmul.mubr.msk.bf16.vlgmr.msra.gmra.mrb[36].mxu1 %vm159_vm0, %v935_v10 }
  0x50   :  { %526 = vmatprep.mubr.bf16.mxu0 %v944_v1  ;;  %915 = vmatprep.mubr.msk.bf16.mxu1 %vm159_vm0, %v939_v18 }
  0x57   :  { %875 = vmatmul.mubr.msk.bf16.gmra.mrb[40].mxu0 %vm159_vm0, %v983_v4  ;;  %916 = vmatmul.mubr.msk.bf16.gmra.mrb[40].mxu1 %vm159_vm0, %v983_v4 }
  0x8a   :  { %v1096_v24 = vpop.permute.xlu0 %45  ;;  %v1098_v25 = vpop.permute.xlu1 %55 }
  0x91   :  { %v1100_v26 = vpop.permute.xlu0 %50  ;;  %v1102_v27 = vpop.permute.xlu1 %60 }
  0x95   :  { %v1104_v28 = vpop.permute.xlu0 %65  ;;  %v1106_v29 = vpop.permute.xlu1 %70 }
  0x99   :  { %v1109_v39 = vpop.permute.xlu0 %75  ;;  %v1112_v41 = vpop.permute.xlu1 %80 }
  0xda   :  { %v206_v30 = vpop.f32.mrb[0].mxu0  ;;  %v236_v31 = vpop.f32.mrb[0].mxu1 }
  0xdb   :  { %v208_v32 = vpop.f32.mrb[1].mxu0  ;;  %v238_v33 = vpop.f32.mrb[1].mxu1  ;;  %v207_v38 = vadd.f32 %v206_v30, %v1096_v24  ;;  %v237_v49 = vadd.f32 %v236_v31, %v1109_v39 }
  0xdc   :  { %v210_v34 = vpop.f32.mrb[2].mxu0  ;;  %v240_v35 = vpop.f32.mrb[2].mxu1  ;;  %v209_v40 = vadd.f32 %v208_v32, %v1096_v24  ;;  %v239_v51 = vadd.f32 %v238_v33, %v1109_v39 }
  0xdd   :  { %v212_v36 = vpop.f32.mrb[3].mxu0  ;;  %v242_v37 = vpop.f32.mrb[3].mxu1  ;;  %v211_v42 = vadd.f32 %v210_v34, %v1100_v26  ;;  %v602_v50 = vmax.f32 %v207_v38, 0.0  ;;  %v241_v52 = vadd.f32 %v240_v35, %v1112_v41  ;;  %v668_v11 = vmax.f32 %v237_v49, 0.0 }
  0xde   :  { %v213_v43 = vadd.f32 %v212_v36, %v1100_v26  ;;  %v603_v56 = vmax.f32 %v209_v40, 0.0  ;;  %v243_v57 = vadd.f32 %v242_v37, %v1112_v41  ;;  %v669_v12 = vmax.f32 %v239_v51, 0.0 }
  0xdf   :  { %v613_v62 = vmax.f32 %v211_v42, 0.0  ;;  %v679_v13 = vmax.f32 %v241_v52, 0.0 }
  0xe0   :  { %v614_v63 = vmax.f32 %v213_v43, 0.0  ;;  %v680_v14 = vmax.f32 %v243_v57, 0.0 }
  0xe2   :  { %v216_v44 = vpop.f32.mrb[4].mxu0  ;;  %v279_v45 = vpop.f32.mrb[4].mxu1 }
  0xe3   :  { %v217_v46 = vadd.f32 %v216_v44, %v1098_v25  ;;  %v218_v47 = vpop.f32.mrb[5].mxu0  ;;  %v281_v48 = vpop.f32.mrb[5].mxu1  ;;  %v280_v3 = vadd.f32 %v279_v45, %v1096_v24 }
  0xe4   :  { %v219_v53 = vadd.f32 %v218_v47, %v1098_v25  ;;  %v220_v54 = vpop.f32.mrb[6].mxu0  ;;  %v283_v55 = vpop.f32.mrb[6].mxu1  ;;  %v282_v4 = vadd.f32 %v281_v48, %v1096_v24 }
  0xe5   :  { %v624_v58 = vmax.f32 %v217_v46, 0.0  ;;  %v221_v59 = vadd.f32 %v220_v54, %v1102_v27  ;;  %v222_v60 = vpop.f32.mrb[7].mxu0  ;;  %v285_v61 = vpop.f32.mrb[7].mxu1  ;;  %v284_v7 = vadd.f32 %v283_v55, %v1100_v26  ;;  %v604_v18 = vmax.f32 %v280_v3, 0.0 }
  0xe6   :  { %v625_v0 = vmax.f32 %v219_v53, 0.0  ;;  %v223_v1 = vadd.f32 %v222_v60, %v1102_v27  ;;  %v286_v9 = vadd.f32 %v285_v61, %v1100_v26  ;;  %v605_v19 = vmax.f32 %v282_v4, 0.0 }
  0xe7   :  { %v690_v2 = vmax.f32 %v602_v50, %v624_v58  ;;  %v635_v5 = vmax.f32 %v221_v59, 0.0  ;;  %v615_v30 = vmax.f32 %v284_v7, 0.0 }
  0xe8   :  { %v691_v6 = vmax.f32 %v603_v56, %v625_v0  ;;  %v636_v8 = vmax.f32 %v223_v1, 0.0  ;;  %v616_v31 = vmax.f32 %v286_v9, 0.0 }
  0xe9   :  { %v701_v10 = vmax.f32 %v613_v62, %v635_v5 }
  0xea   :  { %v702_v15 = vmax.f32 %v614_v63, %v636_v8  ;;  %v226_v16 = vpop.f32.mrb[8].mxu0  ;;  %v289_v17 = vpop.f32.mrb[8].mxu1 }
  0xeb   :  { %v227_v20 = vadd.f32 %v226_v16, %v1104_v28  ;;  %v290_v21 = vadd.f32 %v289_v17, %v1098_v25  ;;  %v228_v22 = vpop.f32.mrb[9].mxu0  ;;  %v291_v23 = vpop.f32.mrb[9].mxu1 }
  0xec   :  { %v229_v32 = vadd.f32 %v228_v22, %v1104_v28  ;;  %v292_v33 = vadd.f32 %v291_v23, %v1098_v25  ;;  %v230_v34 = vpop.f32.mrb[10].mxu0  ;;  %v293_v35 = vpop.f32.mrb[10].mxu1 }
  0xed   :  { %v646_v36 = vmax.f32 %v227_v20, 0.0  ;;  %v626_v37 = vmax.f32 %v290_v21, 0.0  ;;  %v231_v38 = vadd.f32 %v230_v34, %v1106_v29  ;;  %v294_v40 = vadd.f32 %v293_v35, %v1102_v27  ;;  %v232_v42 = vpop.f32.mrb[11].mxu0  ;;  %v295_v43 = vpop.f32.mrb[11].mxu1 }
  0xee   :  { %v647_v44 = vmax.f32 %v229_v32, 0.0  ;;  %v627_v45 = vmax.f32 %v292_v33, 0.0  ;;  %v233_v46 = vadd.f32 %v232_v42, %v1106_v29  ;;  %v296_v47 = vadd.f32 %v295_v43, %v1102_v27 }
  0xef   :  { %v712_v48 = vmax.f32 %v646_v36, %v668_v11  ;;  %v1136_v49 = vmax.f32 %v604_v18, %v626_v37  ;;  %v657_v50 = vmax.f32 %v231_v38, 0.0  ;;  %v637_v51 = vmax.f32 %v294_v40, 0.0 }
  0xf0   :  { %v713_v52 = vmax.f32 %v647_v44, %v669_v12  ;;  %v1138_v53 = vmax.f32 %v605_v19, %v627_v45  ;;  %v658_v54 = vmax.f32 %v233_v46, 0.0  ;;  %v638_v55 = vmax.f32 %v296_v47, 0.0 }
  0xf1   :  { %v734_v56 = vmax.f32 %v690_v2, %v712_v48  ;;  %v723_v57 = vmax.f32 %v657_v50, %v679_v13  ;;  %v1140_v58 = vmax.f32 %v615_v30, %v637_v51 }
  0xf2   :  { %v735_v59 = vmax.f32 %v691_v6, %v713_v52  ;;  %v724_v60 = vmax.f32 %v658_v54, %v680_v14  ;;  %v1142_v61 = vmax.f32 %v616_v31, %v638_v55  ;;  %v299_v62 = vpop.f32.mrb[12].mxu1  ;;  %v352_v63 = vpop.f32.mrb[12].mxu0 }
  0xf3   :  { %v745_v0 = vmax.f32 %v701_v10, %v723_v57  ;;  %v301_v1 = vpop.f32.mrb[13].mxu1  ;;  %v354_v3 = vpop.f32.mrb[13].mxu0  ;;  %v300_v9 = vadd.f32 %v299_v62, %v1104_v28  ;;  %v353_v12 = vadd.f32 %v352_v63, %v1096_v24 }
  0xf4   :  { %v892_v4 = vpack.c.bf16 %v735_v59, %v734_v56  ;;  %v746_v5 = vmax.f32 %v702_v15, %v724_v60  ;;  %v303_v7 = vpop.f32.mrb[14].mxu1  ;;  %v356_v8 = vpop.f32.mrb[14].mxu0  ;;  %v302_v13 = vadd.f32 %v301_v1, %v1104_v28  ;;  %v355_v10 = vadd.f32 %v354_v3, %v1096_v24 }
  0xf5   :  { %v305_v11 = vpop.f32.mrb[15].mxu1  ;;  %v358_v2 = vpop.f32.mrb[15].mxu0  ;;  %v304_v14 = vadd.f32 %v303_v7, %v1106_v29  ;;  %v357_v15 = vadd.f32 %v356_v8, %v1100_v26  ;;  %v648_v18 = vmax.f32 %v300_v9, 0.0  ;;  %v606_v19 = vmax.f32 %v353_v12, 0.0 }
  0xf6   :  { %824 = vst [vmem:[%s1287_s3] sm:$0xff] %v892_v4  ;;  %v898_v6 = vpack.c.bf16 %v746_v5, %v745_v0  ;;  %v306_v16 = vadd.f32 %v305_v11, %v1106_v29  ;;  %v359_v17 = vadd.f32 %v358_v2, %v1100_v26  ;;  %v649_v20 = vmax.f32 %v302_v13, 0.0 }
  0xf7   :  { %v607_v21 = vmax.f32 %v355_v10, 0.0  ;;  %v659_v30 = vmax.f32 %v304_v14, 0.0  ;;  %v617_v31 = vmax.f32 %v357_v15, 0.0 }
  0xf8   :  { %831 = vst [vmem:[%s1287_s3 + $0x2c] sm:$0xff] %v898_v6  ;;  %v660_v36 = vmax.f32 %v306_v16, 0.0  ;;  %v618_v37 = vmax.f32 %v359_v17, 0.0 }
  0xfa   :  { %v309_v22 = vpop.f32.mrb[16].mxu1  ;;  %v362_v23 = vpop.f32.mrb[16].mxu0 }
  0xfb   :  { %v310_v32 = vadd.f32 %v309_v22, %v1109_v39  ;;  %v363_v33 = vadd.f32 %v362_v23, %v1098_v25  ;;  %v311_v34 = vpop.f32.mrb[17].mxu1  ;;  %v364_v35 = vpop.f32.mrb[17].mxu0 }
  0xfc   :  { %v312_v38 = vadd.f32 %v311_v34, %v1109_v39  ;;  %v365_v40 = vadd.f32 %v364_v35, %v1098_v25  ;;  %v313_v42 = vpop.f32.mrb[18].mxu1  ;;  %v366_v43 = vpop.f32.mrb[18].mxu0 }
  0xfd   :  { %v670_v44 = vmax.f32 %v310_v32, 0.0  ;;  %v628_v45 = vmax.f32 %v363_v33, 0.0  ;;  %v314_v46 = vadd.f32 %v313_v42, %v1112_v41  ;;  %v367_v47 = vadd.f32 %v366_v43, %v1102_v27  ;;  %v315_v48 = vpop.f32.mrb[19].mxu1  ;;  %v368_v50 = vpop.f32.mrb[19].mxu0 }
  0xfe   :  { %v671_v51 = vmax.f32 %v312_v38, 0.0  ;;  %v629_v52 = vmax.f32 %v365_v40, 0.0  ;;  %v316_v54 = vadd.f32 %v315_v48, %v1112_v41  ;;  %v369_v55 = vadd.f32 %v368_v50, %v1102_v27 }
  0xff   :  { %v714_v56 = vmax.f32 %v648_v18, %v670_v44  ;;  %v1166_v57 = vmax.f32 %v606_v19, %v628_v45  ;;  %v681_v59 = vmax.f32 %v314_v46, 0.0  ;;  %v639_v60 = vmax.f32 %v367_v47, 0.0 }
 0x100   :  { %v715_v62 = vmax.f32 %v649_v20, %v671_v51  ;;  %v1168_v63 = vmax.f32 %v607_v21, %v629_v52  ;;  %v682_v0 = vmax.f32 %v316_v54, 0.0  ;;  %v640_v1 = vmax.f32 %v369_v55, 0.0 }
 0x101   :  { %v736_v3 = vmax.f32 %v1136_v49, %v714_v56  ;;  %v725_v4 = vmax.f32 %v659_v30, %v681_v59  ;;  %v1171_v5 = vmax.f32 %v617_v31, %v639_v60 }
 0x102   :  { %v737_v7 = vmax.f32 %v1138_v53, %v715_v62  ;;  %v726_v8 = vmax.f32 %v660_v36, %v682_v0  ;;  %v1174_v9 = vmax.f32 %v618_v37, %v640_v1  ;;  %v372_v11 = vpop.f32.mrb[20].mxu0  ;;  %v425_v2 = vpop.f32.mrb[20].mxu1 }
 0x103   :  { %v747_v6 = vmax.f32 %v1140_v58, %v725_v4  ;;  %v374_v12 = vpop.f32.mrb[21].mxu0  ;;  %v427_v13 = vpop.f32.mrb[21].mxu1  ;;  %v373_v49 = vadd.f32 %v372_v11, %v1104_v28  ;;  %v426_v19 = vadd.f32 %v425_v2, %v1096_v24 }
 0x104   :  { %v893_v10 = vpack.c.bf16 %v737_v7, %v736_v3  ;;  %v748_v14 = vmax.f32 %v1142_v61, %v726_v8  ;;  %v376_v15 = vpop.f32.mrb[22].mxu0  ;;  %v429_v16 = vpop.f32.mrb[22].mxu1  ;;  %v375_v58 = vadd.f32 %v374_v12, %v1104_v28  ;;  %v428_v20 = vadd.f32 %v427_v13, %v1096_v24 }
 0x105   :  { %v378_v17 = vpop.f32.mrb[23].mxu0  ;;  %v431_v18 = vpop.f32.mrb[23].mxu1  ;;  %v377_v21 = vadd.f32 %v376_v15, %v1106_v29  ;;  %v430_v61 = vadd.f32 %v429_v16, %v1100_v26  ;;  %v650_v30 = vmax.f32 %v373_v49, 0.0  ;;  %v608_v31 = vmax.f32 %v426_v19, 0.0 }
 0x106   :  { %825 = vst [vmem:[%s1287_s3 + $0x8] sm:$0xff] %v893_v10  ;;  %v899_v53 = vpack.c.bf16 %v748_v14, %v747_v6  ;;  %v379_v22 = vadd.f32 %v378_v17, %v1106_v29  ;;  %v432_v23 = vadd.f32 %v431_v18, %v1100_v26  ;;  %v651_v32 = vmax.f32 %v375_v58, 0.0 }
 0x107   :  { %v609_v33 = vmax.f32 %v428_v20, 0.0  ;;  %v661_v36 = vmax.f32 %v377_v21, 0.0  ;;  %v619_v37 = vmax.f32 %v430_v61, 0.0 }
 0x108   :  { %832 = vst [vmem:[%s1287_s3 + $0x34] sm:$0xff] %v899_v53  ;;  %v662_v44 = vmax.f32 %v379_v22, 0.0  ;;  %v620_v45 = vmax.f32 %v432_v23, 0.0 }
 0x10a   :  { %v382_v34 = vpop.f32.mrb[24].mxu0  ;;  %v435_v35 = vpop.f32.mrb[24].mxu1 }
 0x10b   :  { %v383_v38 = vadd.f32 %v382_v34, %v1109_v39  ;;  %v436_v40 = vadd.f32 %v435_v35, %v1098_v25  ;;  %v384_v42 = vpop.f32.mrb[25].mxu0  ;;  %v437_v43 = vpop.f32.mrb[25].mxu1 }
 0x10c   :  { %v385_v46 = vadd.f32 %v384_v42, %v1109_v39  ;;  %v438_v47 = vadd.f32 %v437_v43, %v1098_v25  ;;  %v386_v48 = vpop.f32.mrb[26].mxu0  ;;  %v439_v50 = vpop.f32.mrb[26].mxu1 }
 0x10d   :  { %v672_v51 = vmax.f32 %v383_v38, 0.0  ;;  %v630_v52 = vmax.f32 %v436_v40, 0.0  ;;  %v387_v54 = vadd.f32 %v386_v48, %v1112_v41  ;;  %v440_v55 = vadd.f32 %v439_v50, %v1102_v27  ;;  %v388_v56 = vpop.f32.mrb[27].mxu0  ;;  %v441_v59 = vpop.f32.mrb[27].mxu1 }
 0x10e   :  { %v673_v60 = vmax.f32 %v385_v46, 0.0  ;;  %v631_v62 = vmax.f32 %v438_v47, 0.0  ;;  %v389_v0 = vadd.f32 %v388_v56, %v1112_v41  ;;  %v442_v1 = vadd.f32 %v441_v59, %v1102_v27 }
 0x10f   :  { %v716_v3 = vmax.f32 %v650_v30, %v672_v51  ;;  %v1200_v4 = vmax.f32 %v608_v31, %v630_v52  ;;  %v683_v7 = vmax.f32 %v387_v54, 0.0  ;;  %v641_v8 = vmax.f32 %v440_v55, 0.0 }
 0x110   :  { %v717_v11 = vmax.f32 %v651_v32, %v673_v60  ;;  %v1202_v2 = vmax.f32 %v609_v33, %v631_v62  ;;  %v684_v6 = vmax.f32 %v389_v0, 0.0  ;;  %v642_v12 = vmax.f32 %v442_v1, 0.0 }
 0x111   :  { %v738_v13 = vmax.f32 %v1166_v57, %v716_v3  ;;  %v727_v10 = vmax.f32 %v661_v36, %v683_v7  ;;  %v1205_v14 = vmax.f32 %v619_v37, %v641_v8 }
 0x112   :  { %v739_v15 = vmax.f32 %v1168_v63, %v717_v11  ;;  %v728_v16 = vmax.f32 %v662_v44, %v684_v6  ;;  %v1208_v49 = vmax.f32 %v620_v45, %v642_v12  ;;  %v445_v17 = vpop.f32.mrb[28].mxu1  ;;  %v498_v18 = vpop.f32.mrb[28].mxu0 }
 0x113   :  { %v749_v53 = vmax.f32 %v1171_v5, %v727_v10  ;;  %v447_v19 = vpop.f32.mrb[29].mxu1  ;;  %v500_v58 = vpop.f32.mrb[29].mxu0  ;;  %v446_v57 = vadd.f32 %v445_v17, %v1104_v28  ;;  %v499_v31 = vadd.f32 %v498_v18, %v1096_v24 }
 0x114   :  { %v894_v20 = vpack.c.bf16 %v739_v15, %v738_v13  ;;  %v750_v21 = vmax.f32 %v1174_v9, %v728_v16  ;;  %v449_v61 = vpop.f32.mrb[30].mxu1  ;;  %v502_v22 = vpop.f32.mrb[30].mxu0  ;;  %v448_v5 = vadd.f32 %v447_v19, %v1104_v28  ;;  %v501_v32 = vadd.f32 %v500_v58, %v1096_v24 }
 0x115   :  { %v451_v23 = vpop.f32.mrb[31].mxu1  ;;  %v504_v30 = vpop.f32.mrb[31].mxu0  ;;  %v450_v33 = vadd.f32 %v449_v61, %v1106_v29  ;;  %v503_v9 = vadd.f32 %v502_v22, %v1100_v26  ;;  %v652_v36 = vmax.f32 %v446_v57, 0.0  ;;  %v610_v37 = vmax.f32 %v499_v31, 0.0 }
 0x116   :  { %826 = vst [vmem:[%s1287_s3 + $0x10] sm:$0xff] %v894_v20  ;;  %v900_v63 = vpack.c.bf16 %v750_v21, %v749_v53  ;;  %v452_v34 = vadd.f32 %v451_v23, %v1106_v29  ;;  %v505_v35 = vadd.f32 %v504_v30, %v1100_v26  ;;  %v653_v38 = vmax.f32 %v448_v5, 0.0 }
 0x117   :  { %v611_v40 = vmax.f32 %v501_v32, 0.0  ;;  %v663_v44 = vmax.f32 %v450_v33, 0.0  ;;  %v621_v45 = vmax.f32 %v503_v9, 0.0 }
 0x118   :  { %833 = vst [vmem:[%s1287_s3 + $0x3c] sm:$0xff] %v900_v63  ;;  %v664_v51 = vmax.f32 %v452_v34, 0.0  ;;  %v622_v52 = vmax.f32 %v505_v35, 0.0 }
 0x11a   :  { %v455_v42 = vpop.f32.mrb[32].mxu1  ;;  %v508_v43 = vpop.f32.mrb[32].mxu0 }
 0x11b   :  { %v456_v46 = vadd.f32 %v455_v42, %v1109_v39  ;;  %v509_v47 = vadd.f32 %v508_v43, %v1098_v25  ;;  %v457_v48 = vpop.f32.mrb[33].mxu1  ;;  %v510_v50 = vpop.f32.mrb[33].mxu0 }
 0x11c   :  { %v458_v54 = vadd.f32 %v457_v48, %v1109_v39  ;;  %v511_v55 = vadd.f32 %v510_v50, %v1098_v25  ;;  %v459_v56 = vpop.f32.mrb[34].mxu1  ;;  %v512_v59 = vpop.f32.mrb[34].mxu0 }
 0x11d   :  { %v674_v60 = vmax.f32 %v456_v46, 0.0  ;;  %v632_v62 = vmax.f32 %v509_v47, 0.0  ;;  %v460_v0 = vadd.f32 %v459_v56, %v1112_v41  ;;  %v513_v1 = vadd.f32 %v512_v59, %v1102_v27  ;;  %v461_v3 = vpop.f32.mrb[35].mxu1  ;;  %v514_v7 = vpop.f32.mrb[35].mxu0 }
 0x11e   :  { %v675_v8 = vmax.f32 %v458_v54, 0.0  ;;  %v633_v11 = vmax.f32 %v511_v55, 0.0  ;;  %v462_v6 = vadd.f32 %v461_v3, %v1112_v41  ;;  %v515_v12 = vadd.f32 %v514_v7, %v1102_v27 }
 0x11f   :  { %v718_v13 = vmax.f32 %v652_v36, %v674_v60  ;;  %v1234_v10 = vmax.f32 %v610_v37, %v632_v62  ;;  %v685_v15 = vmax.f32 %v460_v0, 0.0  ;;  %v643_v16 = vmax.f32 %v513_v1, 0.0 }
 0x120   :  { %v719_v17 = vmax.f32 %v653_v38, %v675_v8  ;;  %v1236_v18 = vmax.f32 %v611_v40, %v633_v11  ;;  %v686_v53 = vmax.f32 %v462_v6, 0.0  ;;  %v644_v19 = vmax.f32 %v515_v12, 0.0 }
 0x121   :  { %v740_v58 = vmax.f32 %v1200_v4, %v718_v13  ;;  %v729_v20 = vmax.f32 %v663_v44, %v685_v15  ;;  %v1239_v21 = vmax.f32 %v621_v45, %v643_v16 }
 0x122   :  { %v741_v61 = vmax.f32 %v1202_v2, %v719_v17  ;;  %v730_v22 = vmax.f32 %v664_v51, %v686_v53  ;;  %v1242_v57 = vmax.f32 %v622_v52, %v644_v19  ;;  %v518_v23 = vpop.f32.mrb[36].mxu0  ;;  %v913_v30 = vpop.f32.mrb[36].mxu1 }
 0x123   :  { %v751_v63 = vmax.f32 %v1205_v14, %v729_v20  ;;  %v580_v31 = vadd.f32 %v913_v30, %v1098_v25  ;;  %v520_v5 = vpop.f32.mrb[37].mxu0  ;;  %v571_v32 = vpop.f32.mrb[37].mxu1  ;;  %v519_v25 = vadd.f32 %v518_v23, %v1104_v28 }
 0x124   :  { %v895_v33 = vpack.c.bf16 %v741_v61, %v740_v58  ;;  %v752_v9 = vmax.f32 %v1208_v49, %v730_v22  ;;  %v572_v4 = vadd.f32 %v571_v32, %v1096_v24  ;;  %v522_v34 = vpop.f32.mrb[38].mxu0  ;;  %v914_v35 = vpop.f32.mrb[38].mxu1  ;;  %v521_v24 = vadd.f32 %v520_v5, %v1104_v28 }
 0x125   :  { %v634_v36 = vmax.f32 %v580_v31, 0.0  ;;  %v583_v2 = vadd.f32 %v914_v35, %v1102_v27  ;;  %v524_v37 = vpop.f32.mrb[39].mxu0  ;;  %v574_v38 = vpop.f32.mrb[39].mxu1  ;;  %v523_v43 = vadd.f32 %v522_v34, %v1106_v29  ;;  %v654_v45 = vmax.f32 %v519_v25, 0.0 }
 0x126   :  { %827 = vst [vmem:[%s1287_s3 + $0x18] sm:$0xff] %v895_v33  ;;  %v901_v14 = vpack.c.bf16 %v752_v9, %v751_v63  ;;  %v612_v40 = vmax.f32 %v572_v4, 0.0  ;;  %v575_v49 = vadd.f32 %v574_v38, %v1100_v26  ;;  %v525_v48 = vadd.f32 %v524_v37, %v1106_v29 }
 0x127   :  { %v645_v42 = vmax.f32 %v583_v2, 0.0  ;;  %v655_v55 = vmax.f32 %v521_v24, 0.0  ;;  %v665_v56 = vmax.f32 %v523_v43, 0.0 }
 0x128   :  { %834 = vst [vmem:[%s1287_s3 + $0x44] sm:$0xff] %v901_v14  ;;  %v700_v27 = vmax.f32 %v612_v40, %v634_v36  ;;  %v623_v44 = vmax.f32 %v575_v49, 0.0  ;;  %v666_v17 = vmax.f32 %v525_v48, 0.0 }
 0x12a   :  { %v528_v46 = vpop.f32.mrb[40].mxu0  ;;  %v917_v47 = vpop.f32.mrb[40].mxu1  ;;  %v711_v50 = vmax.f32 %v623_v44, %v645_v42 }
 0x12b   :  { %v529_v51 = vadd.f32 %v528_v46, %v1109_v39  ;;  %v596_v26 = vadd.f32 %v917_v47, %v1109_v39  ;;  %v530_v52 = vpop.f32.mrb[41].mxu0  ;;  %v587_v54 = vpop.f32.mrb[41].mxu1 }
 0x12c   :  { %v531_v59 = vadd.f32 %v530_v52, %v1109_v39  ;;  %v588_v60 = vadd.f32 %v587_v54, %v1104_v28  ;;  %v532_v62 = vpop.f32.mrb[42].mxu0  ;;  %v918_v0 = vpop.f32.mrb[42].mxu1 }
 0x12d   :  { %v676_v1 = vmax.f32 %v529_v51, 0.0  ;;  %v678_v3 = vmax.f32 %v596_v26, 0.0  ;;  %v533_v7 = vadd.f32 %v532_v62, %v1112_v41  ;;  %v599_v8 = vadd.f32 %v918_v0, %v1112_v41  ;;  %v534_v11 = vpop.f32.mrb[43].mxu0  ;;  %v590_v6 = vpop.f32.mrb[43].mxu1 }
 0x12e   :  { %v677_v12 = vmax.f32 %v531_v59, 0.0  ;;  %v656_v13 = vmax.f32 %v588_v60, 0.0  ;;  %v535_v15 = vadd.f32 %v534_v11, %v1112_v41  ;;  %v591_v16 = vadd.f32 %v590_v6, %v1106_v29 }
 0x12f   :  { %v720_v39 = vmax.f32 %v654_v45, %v676_v1  ;;  %v687_v53 = vmax.f32 %v533_v7, 0.0  ;;  %v689_v28 = vmax.f32 %v599_v8, 0.0 }
 0x130   :  { %v721_v19 = vmax.f32 %v655_v55, %v677_v12  ;;  %v722_v58 = vmax.f32 %v656_v13, %v678_v3  ;;  %v688_v20 = vmax.f32 %v535_v15, 0.0  ;;  %v667_v61 = vmax.f32 %v591_v16, 0.0 }
 0x131   :  { %v742_v22 = vmax.f32 %v1234_v10, %v720_v39  ;;  %v731_v23 = vmax.f32 %v665_v56, %v687_v53 }
 0x132   :  { %v743_v30 = vmax.f32 %v1236_v18, %v721_v19  ;;  %v744_v63 = vmax.f32 %v700_v27, %v722_v58  ;;  %v732_v31 = vmax.f32 %v666_v17, %v688_v20  ;;  %v733_v5 = vmax.f32 %v667_v61, %v689_v28 }
 0x133   :  { %v753_v41 = vmax.f32 %v1239_v21, %v731_v23 }
 0x134   :  { %v896_v29 = vpack.c.bf16 %v743_v30, %v742_v22  ;;  %v897_v32 = vpack.c.bf16 %v744_v63, %v744_v63  ;;  %v754_v33 = vmax.f32 %v1242_v57, %v732_v31  ;;  %v755_v9 = vmax.f32 %v711_v50, %v733_v5 }
 0x136   :  { %828 = vst [vmem:[%s1287_s3 + $0x20] sm:$0xff] %v896_v29  ;;  %830 = vst.msk [vmem:[%s1287_s3 + $0x28] sm:$0xf] %vm829_vm1, %v897_v32  ;;  %v902_v10 = vpack.c.bf16 %v754_v33, %v753_v41  ;;  %v903_v18 = vpack.c.bf16 %v755_v9, %v755_v9 }
 0x138   :  { %835 = vst [vmem:[%s1287_s3 + $0x4c] sm:$0xff] %v902_v10  ;;  %836 = vst.msk [vmem:[%s1287_s3 + $0x54] sm:$0xf] %vm829_vm1, %v903_v18 }

// kernel: cnn_mnist_forward.3
= control target key start
LH: loop header
LB: loop body
LE: loop exit
PB: predicated region body
PF: predicated region fallthrough
CT: control target
= control target key end

     0   :  { %v2432_v0 = vmov 0   ;;  %vm525_vm0 = vcmask 130048   ;;  %s2435_s11 = smov 32   ;;  %vm1112_vm1 = vcmask 261120   ;;  %vm1118_vm2 = vcmask 523520   ;;  %s3319_s1 = inlined_call_operand.vmem [shape: bf16[400,128], index: 1, kind: input, shape index: {}]   ;;  %s3320_s0 = inlined_call_operand.vmem [shape: bf16[200,400], index: 0, kind: input, shape index: {}]   ;;  %s3321_s2 = inlined_call_operand.vmem [shape: f32[1,128], index: 2, kind: input, shape index: {}]   ;;  %s3322_s3 = inlined_call_operand.vmem [shape: bf16[800,128], index: 3, kind: input, shape index: {}]   ;;  %s3323_s5 = inlined_call_operand.vmem [shape: bf16[128,128], index: 5, kind: input, shape index: {}]   ;;  %s3324_s4 = inlined_call_operand.vmem [shape: f32[1,128], index: 4, kind: input, shape index: {}]   ;;  %s3325_s6 = inlined_call_operand.vmem [shape: f32[1,128], index: 6, kind: input, shape index: {}]   ;;  %s3326_s7 = inlined_call_operand.vmem [shape: f32[8,128], index: 7, kind: output, shape index: {}]  }
   0x1   :  { %701 = vmatprep.subr.bf16.mxu1 %v2432_v0  ;;  %v2273_v1 = vld [vmem:[%s3319_s1 + $0x40] sm:$0xff]   ;;  %v2276_v4 = vld [vmem:[%s3319_s1 + $0x48] sm:$0xff]   ;;  %v2279_v7 = vld [vmem:[%s3319_s1 + $0x50] sm:$0xff]   ;;  %vm1124_vm3 = vcmask 785920   ;;  %vm1130_vm4 = vcmask 1048320   ;;  %vm2437_vm5 = vmmov 0  }
   0x2   :  { %v2274_v2 = vld [vmem:[%s3319_s1 + $0x80] sm:$0xff]   ;;  %2067 = vmatprep.subr.bf16.mxu0 %v2273_v1  ;;  %v2277_v5 = vld [vmem:[%s3319_s1 + $0x88] sm:$0xff]   ;;  %v2280_v8 = vld [vmem:[%s3319_s1 + $0x90] sm:$0xff]  }
   0x3   :  { %v2275_v3 = vld [vmem:[%s3319_s1] sm:$0xff]   ;;  %702 = vmatpush1.bf16.msra.mxu1 %v2274_v2  ;;  %v2278_v6 = vld [vmem:[%s3319_s1 + $0x8] sm:$0xff]   ;;  %v2281_v9 = vld [vmem:[%s3319_s1 + $0x10] sm:$0xff]  }
   0x4   :  { %2068 = vmatpush3.bf16.msra.mxu0 %v2275_v3  ;;  %703 = vmatprep.subr.bf16.mxu1 %v2432_v0  ;;  %v2282_v10 = vld [vmem:[%s3319_s1 + $0x58] sm:$0xff]   ;;  %v2285_v13 = vld [vmem:[%s3319_s1 + $0x60] sm:$0xff]   ;;  %v2288_v16 = vld [vmem:[%s3319_s1 + $0x68] sm:$0xff]  }
   0x5   :  { %2069 = vmatprep.subr.bf16.mxu0 %v2276_v4  ;;  %v2283_v11 = vld [vmem:[%s3319_s1 + $0x98] sm:$0xff]   ;;  %v2286_v14 = vld [vmem:[%s3319_s1 + $0xa0] sm:$0xff]   ;;  %v2289_v17 = vld [vmem:[%s3319_s1 + $0xa8] sm:$0xff]  }
   0x6   :  { %v2284_v12 = vld [vmem:[%s3319_s1 + $0x18] sm:$0xff]   ;;  %v2287_v15 = vld [vmem:[%s3319_s1 + $0x20] sm:$0xff]   ;;  %v2290_v18 = vld [vmem:[%s3319_s1 + $0x28] sm:$0xff]  }
   0x7   :  { %704 = vmatpush1.bf16.msra.mxu1 %v2277_v5  ;;  %v2291_v19 = vld [vmem:[%s3319_s1 + $0x70] sm:$0xff]   ;;  %v2294_v22 = vld [vmem:[%s3319_s1 + $0x78] sm:$0xff]   ;;  %v2300_v28 = vld [vmem:[%s3319_s1 + $0xc0] sm:$0xff]  }
   0x8   :  { %2070 = vmatpush3.bf16.msra.mxu0 %v2278_v6  ;;  %705 = vmatprep.subr.bf16.mxu1 %v2432_v0  ;;  %v2292_v20 = vld [vmem:[%s3319_s1 + $0xb0] sm:$0xff]   ;;  %v2295_v24 = vld [vmem:[%s3319_s1 + $0xb8] sm:$0xff]  }
   0x9   :  { %2071 = vmatprep.subr.bf16.mxu0 %v2279_v7  ;;  %v2293_v21 = vld [vmem:[%s3319_s1 + $0x30] sm:$0xff]   ;;  %v2303_v25 = vld [vmem:[%s3320_s0 + $0xc] ss:$16 sps:$4 sm:$0xff]   ;;  %v2301_v30 = vld [vmem:[%s3320_s0 + $0x8] ss:$16 sps:$4 sm:$0xff]  }
   0xa   :  { %v2299_v23 = vld [vmem:[%s3320_s0 + $0x4] ss:$16 sps:$4 sm:$0xff]   ;;  %v2296_v26 = vld [vmem:[%s3319_s1 + $0x38] sm:$0xff]   ;;  %1993 = vmatprep.mubr.msk.bf16.mxu1 %vm525_vm0, %v2303_v25  ;;  %v2297_v27 = vld [vmem:[%s3320_s0] ss:$16 sps:$4 sm:$0xff]  }
   0xb   :  { %706 = vmatpush1.bf16.msra.mxu1 %v2280_v8  ;;  %597 = vmatprep.mubr.bf16.mxu0 %v2299_v23  ;;  %v2304_v29 = vld [vmem:[%s3320_s0 + $0x24] ss:$16 sps:$4 sm:$0xff]   ;;  %v2307_v31 = vld [vmem:[%s3320_s0 + $0x2c] ss:$16 sps:$4 sm:$0xff]   ;;  %v2306_v32 = vld [vmem:[%s3320_s0 + $0x20] ss:$16 sps:$4 sm:$0xff]  }
   0xc   :  { %2072 = vmatpush3.bf16.msra.mxu0 %v2281_v9  ;;  %707 = vmatprep.subr.bf16.mxu1 %v2432_v0  ;;  %v2310_v33 = vld [vmem:[%s3320_s0 + $0x44] ss:$16 sps:$4 sm:$0xff]   ;;  %v2309_v34 = vld [vmem:[%s3320_s0 + $0x28] ss:$16 sps:$4 sm:$0xff]   ;;  %v2313_v35 = vld [vmem:[%s3320_s0 + $0x4c] ss:$16 sps:$4 sm:$0xff]  }
   0xd   :  { %2073 = vmatprep.subr.bf16.mxu0 %v2282_v10  ;;  %v2312_v36 = vld [vmem:[%s3320_s0 + $0x40] ss:$16 sps:$4 sm:$0xff]   ;;  %v2316_v37 = vld [vmem:[%s3320_s0 + $0x64] ss:$16 sps:$4 sm:$0xff]   ;;  %v2315_v38 = vld [vmem:[%s3320_s0 + $0x48] ss:$16 sps:$4 sm:$0xff]  }
   0xe   :  { %v2319_v39 = vld [vmem:[%s3320_s0 + $0x6c] ss:$16 sps:$4 sm:$0xff]   ;;  %v2318_v40 = vld [vmem:[%s3320_s0 + $0x60] ss:$16 sps:$4 sm:$0xff]   ;;  %v2322_v41 = vld [vmem:[%s3320_s0 + $0x84] ss:$16 sps:$4 sm:$0xff]  }
   0xf   :  { %708 = vmatpush1.bf16.msra.mxu1 %v2283_v11  ;;  %v2321_v42 = vld [vmem:[%s3320_s0 + $0x68] ss:$16 sps:$4 sm:$0xff]   ;;  %v2325_v43 = vld [vmem:[%s3320_s0 + $0x8c] ss:$16 sps:$4 sm:$0xff]   ;;  %v2324_v44 = vld [vmem:[%s3320_s0 + $0x80] ss:$16 sps:$4 sm:$0xff]  }
  0x10   :  { %2074 = vmatpush3.bf16.msra.mxu0 %v2284_v12  ;;  %709 = vmatprep.subr.bf16.mxu1 %v2432_v0  ;;  %v2328_v45 = vld [vmem:[%s3320_s0 + $0xa4] ss:$16 sps:$4 sm:$0xff]   ;;  %v2327_v46 = vld [vmem:[%s3320_s0 + $0x88] ss:$16 sps:$4 sm:$0xff]   ;;  %v2331_v47 = vld [vmem:[%s3320_s0 + $0xac] ss:$16 sps:$4 sm:$0xff]  }
  0x11   :  { %2075 = vmatprep.subr.bf16.mxu0 %v2285_v13  ;;  %v2330_v48 = vld [vmem:[%s3320_s0 + $0xa0] ss:$16 sps:$4 sm:$0xff]   ;;  %v2334_v49 = vld [vmem:[%s3320_s0 + $0xc4] ss:$16 sps:$4 sm:$0xff]   ;;  %v2333_v50 = vld [vmem:[%s3320_s0 + $0xa8] ss:$16 sps:$4 sm:$0xff]  }
  0x12   :  { %v2337_v51 = vld [vmem:[%s3320_s0 + $0xcc] ss:$16 sps:$4 sm:$0xff]   ;;  %v2336_v52 = vld [vmem:[%s3320_s0 + $0xc0] ss:$16 sps:$4 sm:$0xff]   ;;  %v2340_v53 = vld [vmem:[%s3320_s0 + $0xe4] ss:$16 sps:$4 sm:$0xff]  }
  0x13   :  { %710 = vmatpush1.bf16.msra.mxu1 %v2286_v14  ;;  %v2339_v54 = vld [vmem:[%s3320_s0 + $0xc8] ss:$16 sps:$4 sm:$0xff]   ;;  %v2343_v55 = vld [vmem:[%s3320_s0 + $0xec] ss:$16 sps:$4 sm:$0xff]   ;;  %v2342_v56 = vld [vmem:[%s3320_s0 + $0xe0] ss:$16 sps:$4 sm:$0xff]  }
  0x14   :  { %2076 = vmatpush3.bf16.msra.mxu0 %v2287_v15  ;;  %711 = vmatprep.subr.bf16.mxu1 %v2432_v0  ;;  %v2346_v57 = vld [vmem:[%s3320_s0 + $0x104] ss:$16 sps:$4 sm:$0xff]   ;;  %v2345_v58 = vld [vmem:[%s3320_s0 + $0xe8] ss:$16 sps:$4 sm:$0xff]   ;;  %v2349_v59 = vld [vmem:[%s3320_s0 + $0x10c] ss:$16 sps:$4 sm:$0xff]  }
  0x15   :  { %2077 = vmatprep.subr.bf16.mxu0 %v2288_v16  ;;  %v2348_v60 = vld [vmem:[%s3320_s0 + $0x100] ss:$16 sps:$4 sm:$0xff]   ;;  %v2352_v61 = vld [vmem:[%s3320_s0 + $0x124] ss:$16 sps:$4 sm:$0xff]   ;;  %v2351_v62 = vld [vmem:[%s3320_s0 + $0x108] ss:$16 sps:$4 sm:$0xff]  }
  0x16   :  { %v2355_v63 = vld [vmem:[%s3320_s0 + $0x12c] ss:$16 sps:$4 sm:$0xff]   ;;  %v2358_v1 = vld [vmem:[%s3320_s0 + $0x144] ss:$16 sps:$4 sm:$0xff]   ;;  %v2357_v2 = vld [vmem:[%s3320_s0 + $0x128] ss:$16 sps:$4 sm:$0xff]  }
  0x17   :  { %712 = vmatpush1.bf16.msra.mxu1 %v2289_v17  ;;  %v2361_v3 = vld [vmem:[%s3320_s0 + $0x14c] ss:$16 sps:$4 sm:$0xff]   ;;  %v2360_v4 = vld [vmem:[%s3320_s0 + $0x140] ss:$16 sps:$4 sm:$0xff]   ;;  %v2364_v5 = vld [vmem:[%s3320_s0 + $0x164] ss:$16 sps:$4 sm:$0xff]  }
  0x18   :  { %2078 = vmatpush3.bf16.msra.mxu0 %v2290_v18  ;;  %713 = vmatprep.subr.bf16.mxu1 %v2432_v0  ;;  %v2363_v6 = vld [vmem:[%s3320_s0 + $0x148] ss:$16 sps:$4 sm:$0xff]   ;;  %v2367_v7 = vld [vmem:[%s3320_s0 + $0x16c] ss:$16 sps:$4 sm:$0xff]   ;;  %v75_v8 = vld [vmem:[%s3320_s0 + $0x180] sm:$0xff] }
  0x19   :  { %2079 = vmatprep.subr.bf16.mxu0 %v2291_v19  ;;  %v2366_v9 = vld [vmem:[%s3320_s0 + $0x160] ss:$16 sps:$4 sm:$0xff]   ;;  %v1965_v10 = vcombine.high %v75_v8, %v75_v8  ;;  %v76_v11 = vld [vmem:[%s3320_s0 + $0x188] sm:$0xff]  ;;  %v1964_v14 = vcombine.low %v75_v8, %v75_v8 }
  0x1a   :  { %v2369_v12 = vld [vmem:[%s3320_s0 + $0x168] ss:$16 sps:$4 sm:$0xff]   ;;  %v1967_v13 = vcombine.high %v76_v11, %v76_v11  ;;  %v1966_v15 = vcombine.low %v76_v11, %v76_v11  ;;  %v2728_v18 = vld [vmem:[%s3321_s2] ss:$0 sm:$0xff]  ;;  %s2434_s2 = smov 64  }
  0x1b   :  { %714 = vmatpush1.bf16.msra.mxu1 %v2292_v20 }
  0x1c   :  { %2080 = vmatpush3.bf16.msra.mxu0 %v2293_v21  ;;  %715 = vmatprep.subr.bf16.mxu1 %v2432_v0 }
  0x1d   :  { %2081 = vmatprep.subr.bf16.mxu0 %v2294_v22 }
  0x1f   :  { %716 = vmatpush1.bf16.msra.mxu1 %v2295_v24 }
  0x20   :  { %2082 = vmatpush3.bf16.msra.mxu0 %v2296_v26  ;;  %717 = vmatprep.subr.bf16.mxu1 %v2432_v0  ;;  %v2354_v0 = vld [vmem:[%s3320_s0 + $0x120] ss:$16 sps:$4 sm:$0xff]   ;;  %s2433_s0 = smov 96  }
  0x23   :  { %598 = vmatmul.mubr.bf16.vlgmr.msra.gmra.mrb[0].mxu0 %v2297_v27  ;;  %718 = vmatpush1.bf16.msra.mxu1 %v2300_v28 }
  0x24   :  { %605 = vmatprep.mubr.bf16.mxu0 %v2304_v29 }
  0x26   :  { %734 = vmatmul.mubr.bf16.vlgmr.msra.gmra.mrb[0].mxu1 %v2301_v30 }
  0x27   :  { %1994 = vmatprep.mubr.msk.bf16.mxu1 %vm525_vm0, %v2307_v31 }
  0x2b   :  { %606 = vmatmul.mubr.bf16.gmra.mrb[4].mxu0 %v2306_v32 }
  0x2c   :  { %613 = vmatprep.mubr.bf16.mxu0 %v2310_v33 }
  0x2e   :  { %742 = vmatmul.mubr.bf16.gmra.mrb[4].mxu1 %v2309_v34 }
  0x2f   :  { %1995 = vmatprep.mubr.msk.bf16.mxu1 %vm525_vm0, %v2313_v35 }
  0x33   :  { %614 = vmatmul.mubr.bf16.gmra.mrb[8].mxu0 %v2312_v36 }
  0x34   :  { %621 = vmatprep.mubr.bf16.mxu0 %v2316_v37 }
  0x36   :  { %750 = vmatmul.mubr.bf16.gmra.mrb[8].mxu1 %v2315_v38 }
  0x37   :  { %1996 = vmatprep.mubr.msk.bf16.mxu1 %vm525_vm0, %v2319_v39 }
  0x3b   :  { %622 = vmatmul.mubr.bf16.gmra.mrb[12].mxu0 %v2318_v40 }
  0x3c   :  { %629 = vmatprep.mubr.bf16.mxu0 %v2322_v41 }
  0x3e   :  { %758 = vmatmul.mubr.bf16.gmra.mrb[12].mxu1 %v2321_v42 }
  0x3f   :  { %1997 = vmatprep.mubr.msk.bf16.mxu1 %vm525_vm0, %v2325_v43 }
  0x43   :  { %630 = vmatmul.mubr.bf16.gmra.mrb[16].mxu0 %v2324_v44 }
  0x44   :  { %637 = vmatprep.mubr.bf16.mxu0 %v2328_v45 }
  0x46   :  { %766 = vmatmul.mubr.bf16.gmra.mrb[16].mxu1 %v2327_v46 }
  0x47   :  { %1998 = vmatprep.mubr.msk.bf16.mxu1 %vm525_vm0, %v2331_v47 }
  0x4b   :  { %638 = vmatmul.mubr.bf16.gmra.mrb[20].mxu0 %v2330_v48 }
  0x4c   :  { %645 = vmatprep.mubr.bf16.mxu0 %v2334_v49 }
  0x4e   :  { %774 = vmatmul.mubr.bf16.gmra.mrb[20].mxu1 %v2333_v50 }
  0x4f   :  { %1999 = vmatprep.mubr.msk.bf16.mxu1 %vm525_vm0, %v2337_v51 }
  0x53   :  { %646 = vmatmul.mubr.bf16.gmra.mrb[24].mxu0 %v2336_v52 }
  0x54   :  { %653 = vmatprep.mubr.bf16.mxu0 %v2340_v53 }
  0x56   :  { %782 = vmatmul.mubr.bf16.gmra.mrb[24].mxu1 %v2339_v54 }
  0x57   :  { %2000 = vmatprep.mubr.msk.bf16.mxu1 %vm525_vm0, %v2343_v55 }
  0x5b   :  { %654 = vmatmul.mubr.bf16.gmra.mrb[28].mxu0 %v2342_v56 }
  0x5c   :  { %661 = vmatprep.mubr.bf16.mxu0 %v2346_v57 }
  0x5e   :  { %790 = vmatmul.mubr.bf16.gmra.mrb[28].mxu1 %v2345_v58 }
  0x5f   :  { %2001 = vmatprep.mubr.msk.bf16.mxu1 %vm525_vm0, %v2349_v59 }
  0x63   :  { %662 = vmatmul.mubr.bf16.gmra.mrb[32].mxu0 %v2348_v60 }
  0x64   :  { %669 = vmatprep.mubr.bf16.mxu0 %v2352_v61 }
  0x66   :  { %798 = vmatmul.mubr.bf16.gmra.mrb[32].mxu1 %v2351_v62 }
  0x67   :  { %2002 = vmatprep.mubr.msk.bf16.mxu1 %vm525_vm0, %v2355_v63 }
  0x6b   :  { %670 = vmatmul.mubr.bf16.gmra.mrb[36].mxu0 %v2354_v0 }
  0x6c   :  { %677 = vmatprep.mubr.bf16.mxu0 %v2358_v1 }
  0x6e   :  { %806 = vmatmul.mubr.bf16.gmra.mrb[36].mxu1 %v2357_v2 }
  0x6f   :  { %2003 = vmatprep.mubr.msk.bf16.mxu1 %vm525_vm0, %v2361_v3 }
  0x73   :  { %678 = vmatmul.mubr.bf16.gmra.mrb[40].mxu0 %v2360_v4 }
  0x74   :  { %685 = vmatprep.mubr.bf16.mxu0 %v2364_v5 }
  0x76   :  { %814 = vmatmul.mubr.bf16.gmra.mrb[40].mxu1 %v2363_v6 }
  0x77   :  { %2004 = vmatprep.mubr.msk.bf16.mxu1 %vm525_vm0, %v2367_v7 }
  0x7b   :  { %686 = vmatmul.mubr.bf16.gmra.mrb[44].mxu0 %v2366_v9 }
  0x7c   :  { %693 = vmatprep.mubr.bf16.mxu0 %v1965_v10 }
  0x7e   :  { %822 = vmatmul.mubr.bf16.gmra.mrb[44].mxu1 %v2369_v12 }
  0x7f   :  { %2005 = vmatprep.mubr.msk.bf16.mxu1 %vm525_vm0, %v1967_v13 }
  0x83   :  { %694 = vmatmul.mubr.bf16.gmra.mrb[48].mxu0 %v1964_v14 }
  0x86   :  { %830 = vmatmul.mubr.bf16.gmra.mrb[48].mxu1 %v1966_v15 }
  0xf6   :  { %v2083_v16 = vpop.f32.mrb[0].mxu0 }
  0xf7   :  { %v2084_v17 = vpop.f32.mrb[1].mxu0 }
  0xf8   :  { %v2085_v19 = vadd.f32 %v2084_v17, %v2083_v16  ;;  %v2086_v20 = vpop.f32.mrb[2].mxu0 }
  0xf9   :  { %v2087_v21 = vpop.f32.mrb[3].mxu0  ;;  %v735_v22 = vpop.f32.mrb[0].mxu1 }
  0xfa   :  { %v2088_v23 = vadd.f32 %v2087_v21, %v2086_v20  ;;  %v600_v24 = vadd.f32 %v2085_v19, %v2728_v18  ;;  %v737_v25 = vpop.f32.mrb[1].mxu1 }
  0xfb   :  { %v738_v26 = vpop.f32.mrb[2].mxu1 }
  0xfc   :  { %v2731_v27 = vadd.f32 %v735_v22, %v600_v24  ;;  %v603_v28 = vadd.f32 %v2088_v23, %v2728_v18  ;;  %v740_v29 = vpop.f32.mrb[3].mxu1 }
  0xfe   :  { %v2734_v30 = vadd.f32 %v738_v26, %v603_v28  ;;  %v2089_v31 = vpop.f32.mrb[4].mxu0 }
  0xff   :  { %v2090_v32 = vpop.f32.mrb[5].mxu0 }
 0x100   :  { %v838_v33 = vmax.f32 %v2734_v30, 0.0  ;;  %v2091_v34 = vadd.f32 %v2090_v32, %v2089_v31  ;;  %v2092_v35 = vpop.f32.mrb[6].mxu0 }
 0x101   :  { %v2093_v36 = vpop.f32.mrb[7].mxu0  ;;  %v743_v37 = vpop.f32.mrb[4].mxu1 }
 0x102   :  { %v2094_v38 = vadd.f32 %v2093_v36, %v2092_v35  ;;  %v608_v39 = vadd.f32 %v2091_v34, %v2728_v18  ;;  %v745_v40 = vpop.f32.mrb[5].mxu1  ;;  %889 = vrot.lane.b32.xlu0 %v838_v33, %s2433_s0 }
 0x103   :  { %v746_v41 = vpop.f32.mrb[6].mxu1 }
 0x104   :  { %v2741_v42 = vadd.f32 %v743_v37, %v608_v39  ;;  %v611_v43 = vadd.f32 %v2094_v38, %v2728_v18  ;;  %v748_v44 = vpop.f32.mrb[7].mxu1 }
 0x106   :  { %v839_v45 = vmax.f32 %v2741_v42, 0.0  ;;  %v2745_v46 = vadd.f32 %v746_v41, %v611_v43  ;;  %v2095_v47 = vpop.f32.mrb[8].mxu0 }
 0x107   :  { %v2096_v48 = vpop.f32.mrb[9].mxu0 }
 0x108   :  { %v2097_v49 = vadd.f32 %v2096_v48, %v2095_v47  ;;  %v2098_v50 = vpop.f32.mrb[10].mxu0  ;;  %891 = vrot.lane.b32.xlu1 %v839_v45, %s2433_s0  ;;  %v840_v21 = vmax.f32 %v2745_v46, 0.0 }
 0x109   :  { %v2099_v51 = vpop.f32.mrb[11].mxu0  ;;  %v751_v52 = vpop.f32.mrb[8].mxu1 }
 0x10a   :  { %v2100_v53 = vadd.f32 %v2099_v51, %v2098_v50  ;;  %v616_v54 = vadd.f32 %v2097_v49, %v2728_v18  ;;  %v753_v55 = vpop.f32.mrb[9].mxu1 }
 0x10b   :  { %v754_v56 = vpop.f32.mrb[10].mxu1 }
 0x10c   :  { %v2751_v57 = vadd.f32 %v751_v52, %v616_v54  ;;  %v619_v58 = vadd.f32 %v2100_v53, %v2728_v18  ;;  %v756_v59 = vpop.f32.mrb[11].mxu1 }
 0x10e   :  { %v2754_v60 = vadd.f32 %v754_v56, %v619_v58  ;;  %v2101_v61 = vpop.f32.mrb[12].mxu0 }
 0x10f   :  { %v2102_v62 = vpop.f32.mrb[13].mxu0 }
 0x110   :  { %v842_v63 = vmax.f32 %v2754_v60, 0.0  ;;  %v2103_v0 = vadd.f32 %v2102_v62, %v2101_v61  ;;  %v2104_v1 = vpop.f32.mrb[14].mxu0 }
 0x111   :  { %v2105_v2 = vpop.f32.mrb[15].mxu0  ;;  %v759_v3 = vpop.f32.mrb[12].mxu1 }
 0x112   :  { %v2106_v4 = vadd.f32 %v2105_v2, %v2104_v1  ;;  %v624_v5 = vadd.f32 %v2103_v0, %v2728_v18  ;;  %v761_v6 = vpop.f32.mrb[13].mxu1  ;;  %897 = vrot.lane.b32.xlu0 %v842_v63, %s2433_s0 }
 0x113   :  { %v762_v7 = vpop.f32.mrb[14].mxu1 }
 0x114   :  { %v2761_v8 = vadd.f32 %v759_v3, %v624_v5  ;;  %v627_v9 = vadd.f32 %v2106_v4, %v2728_v18  ;;  %v764_v10 = vpop.f32.mrb[15].mxu1 }
 0x116   :  { %v843_v11 = vmax.f32 %v2761_v8, 0.0  ;;  %v2765_v12 = vadd.f32 %v762_v7, %v627_v9  ;;  %v2107_v13 = vpop.f32.mrb[16].mxu0 }
 0x117   :  { %v2108_v14 = vpop.f32.mrb[17].mxu0 }
 0x118   :  { %v844_v15 = vmax.f32 %v2765_v12, 0.0  ;;  %v2109_v16 = vadd.f32 %v2108_v14, %v2107_v13  ;;  %v2110_v17 = vpop.f32.mrb[18].mxu0  ;;  %899 = vrot.lane.b32.xlu1 %v843_v11, %s2433_s0 }
 0x119   :  { %v2111_v19 = vpop.f32.mrb[19].mxu0  ;;  %v767_v20 = vpop.f32.mrb[16].mxu1 }
 0x11a   :  { %v2112_v22 = vadd.f32 %v2111_v19, %v2110_v17  ;;  %v632_v23 = vadd.f32 %v2109_v16, %v2728_v18  ;;  %v769_v24 = vpop.f32.mrb[17].mxu1  ;;  %901 = vrot.lane.b32.xlu0 %v844_v15, %s2433_s0 }
 0x11b   :  { %v770_v25 = vpop.f32.mrb[18].mxu1 }
 0x11c   :  { %v2776_v26 = vadd.f32 %v767_v20, %v632_v23  ;;  %v635_v28 = vadd.f32 %v2112_v22, %v2728_v18  ;;  %v772_v29 = vpop.f32.mrb[19].mxu1  ;;  %893 = vrot.lane.b32.xlu1 %v840_v21, %s2433_s0 }
 0x11e   :  { %v2782_v31 = vadd.f32 %v770_v25, %v635_v28  ;;  %v2113_v32 = vpop.f32.mrb[20].mxu0  ;;  %v845_v46 = vmax.f32 %v2776_v26, 0.0 }
 0x11f   :  { %v2114_v34 = vpop.f32.mrb[21].mxu0 }
 0x120   :  { %v846_v35 = vmax.f32 %v2782_v31, 0.0  ;;  %v2115_v36 = vadd.f32 %v2114_v34, %v2113_v32  ;;  %v2116_v37 = vpop.f32.mrb[22].mxu0 }
 0x121   :  { %v2117_v38 = vpop.f32.mrb[23].mxu0  ;;  %v775_v39 = vpop.f32.mrb[20].mxu1 }
 0x122   :  { %v2118_v40 = vadd.f32 %v2117_v38, %v2116_v37  ;;  %v640_v41 = vadd.f32 %v2115_v36, %v2728_v18  ;;  %v777_v43 = vpop.f32.mrb[21].mxu1  ;;  %905 = vrot.lane.b32.xlu0 %v846_v35, %s2433_s0 }
 0x123   :  { %v778_v44 = vpop.f32.mrb[22].mxu1 }
 0x124   :  { %v2789_v47 = vadd.f32 %v775_v39, %v640_v41  ;;  %v643_v48 = vadd.f32 %v2118_v40, %v2728_v18  ;;  %v780_v49 = vpop.f32.mrb[23].mxu1 }
 0x126   :  { %v847_v50 = vmax.f32 %v2789_v47, 0.0  ;;  %v2793_v51 = vadd.f32 %v778_v44, %v643_v48  ;;  %v2119_v52 = vpop.f32.mrb[24].mxu0 }
 0x127   :  { %v2120_v53 = vpop.f32.mrb[25].mxu0 }
 0x128   :  { %v2121_v54 = vadd.f32 %v2120_v53, %v2119_v52  ;;  %v2122_v55 = vpop.f32.mrb[26].mxu0  ;;  %907 = vrot.lane.b32.xlu0 %v847_v50, %s2433_s0 }
 0x129   :  { %v2123_v56 = vpop.f32.mrb[27].mxu0  ;;  %v783_v58 = vpop.f32.mrb[24].mxu1 }
 0x12a   :  { %v2124_v59 = vadd.f32 %v2123_v56, %v2122_v55  ;;  %v648_v61 = vadd.f32 %v2121_v54, %v2728_v18  ;;  %v785_v62 = vpop.f32.mrb[25].mxu1 }
 0x12b   :  { %v786_v0 = vpop.f32.mrb[26].mxu1 }
 0x12c   :  { %v2799_v1 = vadd.f32 %v783_v58, %v648_v61  ;;  %v651_v2 = vadd.f32 %v2124_v59, %v2728_v18  ;;  %v788_v3 = vpop.f32.mrb[27].mxu1 }
 0x12e   :  { %v2802_v4 = vadd.f32 %v786_v0, %v651_v2  ;;  %v2125_v5 = vpop.f32.mrb[28].mxu0 }
 0x12f   :  { %v2126_v6 = vpop.f32.mrb[29].mxu0 }
 0x130   :  { %v850_v7 = vmax.f32 %v2802_v4, 0.0  ;;  %v2127_v9 = vadd.f32 %v2126_v6, %v2125_v5  ;;  %v2128_v10 = vpop.f32.mrb[30].mxu0 }
 0x131   :  { %v2129_v13 = vpop.f32.mrb[31].mxu0  ;;  %v791_v14 = vpop.f32.mrb[28].mxu1 }
 0x132   :  { %v2130_v16 = vadd.f32 %v2129_v13, %v2128_v10  ;;  %v656_v17 = vadd.f32 %v2127_v9, %v2728_v18  ;;  %v793_v19 = vpop.f32.mrb[29].mxu1  ;;  %913 = vrot.lane.b32.xlu1 %v850_v7, %s2433_s0 }
 0x133   :  { %v794_v20 = vpop.f32.mrb[30].mxu1 }
 0x134   :  { %v2809_v22 = vadd.f32 %v791_v14, %v656_v17  ;;  %v659_v23 = vadd.f32 %v2130_v16, %v2728_v18  ;;  %v796_v24 = vpop.f32.mrb[31].mxu1 }
 0x136   :  { %v851_v25 = vmax.f32 %v2809_v22, 0.0  ;;  %v2813_v28 = vadd.f32 %v794_v20, %v659_v23  ;;  %v2131_v29 = vpop.f32.mrb[32].mxu0 }
 0x137   :  { %v2132_v32 = vpop.f32.mrb[33].mxu0 }
 0x138   :  { %v2133_v34 = vadd.f32 %v2132_v32, %v2131_v29  ;;  %v2134_v36 = vpop.f32.mrb[34].mxu0  ;;  %915 = vrot.lane.b32.xlu1 %v851_v25, %s2433_s0  ;;  %v852_v39 = vmax.f32 %v2813_v28, 0.0  ;;  %v2374_v28 = vld [vmem:[%s3322_s3 + $0x40] sm:$0xff]  }
 0x139   :  { %v2135_v37 = vpop.f32.mrb[35].mxu0  ;;  %v799_v38 = vpop.f32.mrb[32].mxu1  ;;  %2161 = vmatprep.subr.bf16.mxu0 %v2374_v28 }
 0x13a   :  { %v2136_v40 = vadd.f32 %v2135_v37, %v2134_v36  ;;  %v664_v41 = vadd.f32 %v2133_v34, %v2728_v18  ;;  %v801_v43 = vpop.f32.mrb[33].mxu1 }
 0x13b   :  { %v802_v44 = vpop.f32.mrb[34].mxu1 }
 0x13c   :  { %v2820_v48 = vadd.f32 %v799_v38, %v664_v41  ;;  %v667_v49 = vadd.f32 %v2136_v40, %v2728_v18  ;;  %v804_v52 = vpop.f32.mrb[35].mxu1  ;;  %917 = vrot.lane.b32.xlu1 %v852_v39, %s2433_s0 }
 0x13e   :  { %v2826_v53 = vadd.f32 %v802_v44, %v667_v49  ;;  %v2137_v54 = vpop.f32.mrb[36].mxu0 }
 0x13f   :  { %v2138_v55 = vpop.f32.mrb[37].mxu0 }
 0x140   :  { %v854_v56 = vmax.f32 %v2826_v53, 0.0  ;;  %v2139_v58 = vadd.f32 %v2138_v55, %v2137_v54  ;;  %v2140_v59 = vpop.f32.mrb[38].mxu0 }
 0x141   :  { %v2141_v61 = vpop.f32.mrb[39].mxu0  ;;  %v807_v62 = vpop.f32.mrb[36].mxu1 }
 0x142   :  { %v2142_v0 = vadd.f32 %v2141_v61, %v2140_v59  ;;  %v672_v2 = vadd.f32 %v2139_v58, %v2728_v18  ;;  %v809_v3 = vpop.f32.mrb[37].mxu1  ;;  %921 = vrot.lane.b32.xlu0 %v854_v56, %s2433_s0 }
 0x143   :  { %v810_v5 = vpop.f32.mrb[38].mxu1 }
 0x144   :  { %v2833_v6 = vadd.f32 %v807_v62, %v672_v2  ;;  %v675_v9 = vadd.f32 %v2142_v0, %v2728_v18  ;;  %v812_v10 = vpop.f32.mrb[39].mxu1 }
 0x146   :  { %v855_v13 = vmax.f32 %v2833_v6, 0.0  ;;  %v2837_v14 = vadd.f32 %v810_v5, %v675_v9  ;;  %v2143_v16 = vpop.f32.mrb[40].mxu0 }
 0x147   :  { %v2144_v17 = vpop.f32.mrb[41].mxu0 }
 0x148   :  { %v2145_v19 = vadd.f32 %v2144_v17, %v2143_v16  ;;  %v2146_v20 = vpop.f32.mrb[42].mxu0  ;;  %923 = vrot.lane.b32.xlu0 %v855_v13, %s2433_s0  ;;  %v856_v2 = vmax.f32 %v2837_v14, 0.0 }
 0x149   :  { %v2147_v23 = vpop.f32.mrb[43].mxu0  ;;  %v815_v24 = vpop.f32.mrb[40].mxu1 }
 0x14a   :  { %v2148_v29 = vadd.f32 %v2147_v23, %v2146_v20  ;;  %v680_v32 = vadd.f32 %v2145_v19, %v2728_v18  ;;  %v817_v34 = vpop.f32.mrb[41].mxu1  ;;  %v841_v20 = vmax.f32 %v2751_v57, 0.0  ;;  %v2382_v57 = vld [vmem:[%s3322_s3 + $0x58] sm:$0xff]  }
 0x14b   :  { %v818_v36 = vpop.f32.mrb[42].mxu1 }
 0x14c   :  { %v2843_v37 = vadd.f32 %v815_v24, %v680_v32  ;;  %v683_v38 = vadd.f32 %v2148_v29, %v2728_v18  ;;  %v820_v40 = vpop.f32.mrb[43].mxu1 }
 0x14e   :  { %v2846_v41 = vadd.f32 %v818_v36, %v683_v38  ;;  %v2149_v43 = vpop.f32.mrb[44].mxu0  ;;  %v857_v8 = vmax.f32 %v2843_v37, 0.0 }
 0x14f   :  { %v2150_v44 = vpop.f32.mrb[45].mxu0 }
 0x150   :  { %v858_v49 = vmax.f32 %v2846_v41, 0.0  ;;  %v2151_v52 = vadd.f32 %v2150_v44, %v2149_v43  ;;  %v2152_v54 = vpop.f32.mrb[46].mxu0 }
 0x151   :  { %v2153_v55 = vpop.f32.mrb[47].mxu0  ;;  %v823_v58 = vpop.f32.mrb[44].mxu1 }
 0x152   :  { %v2154_v59 = vadd.f32 %v2153_v55, %v2152_v54  ;;  %v688_v61 = vadd.f32 %v2151_v52, %v2728_v18  ;;  %v825_v62 = vpop.f32.mrb[45].mxu1  ;;  %929 = vrot.lane.b32.xlu0 %v858_v49, %s2433_s0  ;;  %v848_v52 = vmax.f32 %v2793_v51, 0.0  ;;  %v837_v54 = vmax.f32 %v2731_v27, 0.0  ;;  %v2381_v51 = vld [vmem:[%s3322_s3 + $0x80] sm:$0xff]   ;;  %v2383_v27 = vld [vmem:[%s3322_s3 + $0x18] sm:$0xff]  }
 0x153   :  { %v826_v0 = vpop.f32.mrb[46].mxu1 }
 0x154   :  { %v2854_v3 = vadd.f32 %v823_v58, %v688_v61  ;;  %v691_v5 = vadd.f32 %v2154_v59, %v2728_v18  ;;  %v828_v9 = vpop.f32.mrb[47].mxu1 }
 0x156   :  { %v859_v10 = vmax.f32 %v2854_v3, 0.0  ;;  %v2858_v16 = vadd.f32 %v826_v0, %v691_v5  ;;  %925 = vrot.lane.b32.xlu0 %v856_v2, %s2433_s0  ;;  %v2155_v17 = vpop.f32.mrb[48].mxu0  ;;  %v2379_v3 = vld [vmem:[%s3322_s3 + $0x10] sm:$0xff]  }
 0x157   :  { %v2156_v19 = vpop.f32.mrb[49].mxu0 }
 0x158   :  { %931 = vrot.lane.b32.xlu1 %v859_v10, %s2433_s0  ;;  %v2157_v23 = vadd.f32 %v2156_v19, %v2155_v17  ;;  %v2158_v24 = vpop.f32.mrb[50].mxu0  ;;  %v860_v34 = vmax.f32 %v2858_v16, 0.0 }
 0x159   :  { %v831_v29 = vpop.f32.mrb[48].mxu1  ;;  %v2159_v32 = vpop.f32.mrb[51].mxu0  ;;  %v2376_v24 = vld [vmem:[%s3322_s3 + $0x48] sm:$0xff]  }
 0x15a   :  { %895 = vrot.lane.b32.xlu0 %v841_v20, %s2433_s0  ;;  %v696_v36 = vadd.f32 %v2157_v23, %v2728_v18  ;;  %v833_v38 = vpop.f32.mrb[49].mxu1 }
 0x15b   :  { %v834_v40 = vpop.f32.mrb[50].mxu1 }
 0x15c   :  { %933 = vrot.lane.b32.xlu1 %v860_v34, %s2433_s0  ;;  %v2875_v43 = vadd.f32 %v831_v29, %v696_v36  ;;  %v835_v44 = vpop.f32.mrb[51].mxu1  ;;  %v2380_v29 = vld [vmem:[%s3322_s3 + $0xc0] sm:$0xff]  }
 0x15d   :  { %2183 = vmatprep.subr.bf16.mxu1 %v2380_v29  ;;  %v2385_v44 = vld [vmem:[%s3322_s3 + $0x88] sm:$0xff]  }
 0x15e   :  { %v861_v19 = vmax.f32 %v2875_v43, 0.0  ;;  %2184 = vmatpush3.bf16.msra.mxu1 %v2381_v51 }
 0x160   :  { %909 = vrot.lane.b32.xlu1 %v848_v52, %s2433_s0 }
 0x164   :  { %887 = vrot.lane.b32.xlu1 %v837_v54, %s2433_s0 }
 0x174   :  { %v890_v18 = vpop.permute.xlu0 %889 }
 0x175   :  { %v2887_v55 = vmax.f32 %v838_v33, %v890_v18 }
 0x177   :  { %1014 = vrot.lane.b32.xlu1 %v2887_v55, %s2434_s2 }
 0x17a   :  { %v892_v58 = vpop.permute.xlu1 %891 }
 0x17b   :  { %v2893_v59 = vmax.f32 %v839_v45, %v892_v58  ;;  %v2386_v58 = vld [vmem:[%s3322_s3 + $0x60] sm:$0xff]  }
 0x17d   :  { %1016 = vrot.lane.b32.xlu1 %v2893_v59, %s2434_s2 }
 0x184   :  { %v898_v61 = vpop.permute.xlu0 %897 }
 0x185   :  { %v2899_v62 = vmax.f32 %v842_v63, %v898_v61  ;;  %v849_v63 = vmax.f32 %v2799_v1, 0.0  ;;  %v2387_v61 = vld [vmem:[%s3322_s3 + $0x20] sm:$0xff]  }
 0x187   :  { %1022 = vrot.lane.b32.xlu0 %v2899_v62, %s2434_s2 }
 0x18a   :  { %v900_v30 = vpop.permute.xlu1 %899 }
 0x18b   :  { %v2905_v33 = vmax.f32 %v843_v11, %v900_v30  ;;  %v853_v11 = vmax.f32 %v2820_v48, 0.0  ;;  %v2399_v48 = vld [vmem:[%s3322_s3 + $0xa0] sm:$0xff]  }
 0x18c   :  { %v902_v0 = vpop.permute.xlu0 %901 }
 0x18d   :  { %1024 = vrot.lane.b32.xlu0 %v2905_v33, %s2434_s2  ;;  %v2911_v45 = vmax.f32 %v844_v15, %v902_v0  ;;  %v2389_v0 = vld [vmem:[%s3322_s3 + $0xd0] sm:$0xff]  }
 0x18e   :  { %v894_v42 = vpop.permute.xlu1 %893 }
 0x18f   :  { %v2915_v60 = vmax.f32 %v840_v21, %v894_v42  ;;  %v2390_v42 = vld [vmem:[%s3322_s3 + $0x28] sm:$0xff]  }
 0x191   :  { %1026 = vrot.lane.b32.xlu0 %v2911_v45, %s2434_s2  ;;  %1018 = vrot.lane.b32.xlu1 %v2915_v60, %s2434_s2 }
 0x194   :  { %v906_v12 = vpop.permute.xlu0 %905 }
 0x195   :  { %927 = vrot.lane.b32.xlu0 %v857_v8, %s2433_s0  ;;  %911 = vrot.lane.b32.xlu1 %v849_v63, %s2433_s0  ;;  %v2939_v15 = vmax.f32 %v846_v35, %v906_v12 }
 0x199   :  { %919 = vrot.lane.b32.xlu0 %v853_v11, %s2433_s0  ;;  %903 = vrot.lane.b32.xlu1 %v845_v46, %s2433_s0 }
 0x19a   :  { %v908_v21 = vpop.permute.xlu0 %907 }
 0x19b   :  { %v2945_v5 = vmax.f32 %v847_v50, %v908_v21  ;;  %v2392_v21 = vld [vmem:[%s3322_s3 + $0x70] sm:$0xff]  }
 0x19d   :  { %1030 = vrot.lane.b32.xlu0 %v2939_v15, %s2434_s2 }
 0x1a1   :  { %1032 = vrot.lane.b32.xlu0 %v2945_v5, %s2434_s2 }
 0x1a4   :  { %v914_v9 = vpop.permute.xlu1 %913 }
 0x1a5   :  { %v2951_v17 = vmax.f32 %v850_v7, %v914_v9 }
 0x1a7   :  { %1038 = vrot.lane.b32.xlu1 %v2951_v17, %s2434_s2 }
 0x1aa   :  { %v916_v31 = vpop.permute.xlu1 %915 }
 0x1ab   :  { %v2957_v35 = vmax.f32 %v851_v25, %v916_v31  ;;  %v2393_v31 = vld [vmem:[%s3322_s3 + $0x30] sm:$0xff]  }
 0x1ad   :  { %1040 = vrot.lane.b32.xlu1 %v2957_v35, %s2434_s2 }
 0x1ae   :  { %v918_v47 = vpop.permute.xlu1 %917 }
 0x1af   :  { %v2963_v50 = vmax.f32 %v852_v39, %v918_v47  ;;  %v2375_v39 = vld [vmem:[%s3322_s3] sm:$0xff]   ;;  %v2394_v47 = vld [vmem:[%s3322_s3 + $0x78] sm:$0xff]  }
 0x1b0   :  { %2162 = vmatpush3.bf16.msra.mxu0 %v2375_v39 }
 0x1b1   :  { %1042 = vrot.lane.b32.xlu1 %v2963_v50, %s2434_s2  ;;  %2163 = vmatprep.subr.bf16.mxu0 %v2376_v24  ;;  %v2397_v24 = vld [vmem:[%s3322_s3 + $0x98] sm:$0xff]  }
 0x1b4   :  { %v922_v4 = vpop.permute.xlu0 %921 }
 0x1b5   :  { %v2969_v7 = vmax.f32 %v854_v56, %v922_v4 }
 0x1b7   :  { %1046 = vrot.lane.b32.xlu0 %v2969_v7, %s2434_s2 }
 0x1ba   :  { %v924_v22 = vpop.permute.xlu0 %923 }
 0x1bb   :  { %v2975_v25 = vmax.f32 %v855_v13, %v924_v22  ;;  %v2395_v22 = vld [vmem:[%s3322_s3 + $0x38] sm:$0xff]  }
 0x1bd   :  { %1048 = vrot.lane.b32.xlu0 %v2975_v25, %s2434_s2 }
 0x1c4   :  { %v930_v53 = vpop.permute.xlu0 %929 }
 0x1c5   :  { %v2987_v56 = vmax.f32 %v858_v49, %v930_v53  ;;  %v2377_v49 = vld [vmem:[%s3322_s3 + $0x8] sm:$0xff]  }
 0x1c6   :  { %2164 = vmatpush3.bf16.msra.mxu0 %v2377_v49 }
 0x1c7   :  { %1054 = vrot.lane.b32.xlu0 %v2987_v56, %s2434_s2 }
 0x1c8   :  { %v926_v6 = vpop.permute.xlu0 %925 }
 0x1c9   :  { %v2993_v13 = vmax.f32 %v856_v2, %v926_v6  ;;  %v2378_v2 = vld [vmem:[%s3322_s3 + $0x50] sm:$0xff]  }
 0x1ca   :  { %v932_v23 = vpop.permute.xlu1 %931  ;;  %2165 = vmatprep.subr.bf16.mxu0 %v2378_v2 }
 0x1cb   :  { %v3001_v41 = vmax.f32 %v859_v10, %v932_v23  ;;  %1050 = vrot.lane.b32.xlu0 %v2993_v13, %s2434_s2  ;;  %2166 = vmatpush3.bf16.msra.mxu0 %v2379_v3  ;;  %v2396_v23 = vld [vmem:[%s3322_s3 + $0xd8] sm:$0xff]  }
 0x1cc   :  { %2167 = vmatprep.subr.bf16.mxu0 %v2382_v57  ;;  %v2406_v57 = vld [vmem:[%s3322_s3 + $0xf0] sm:$0xff]  }
 0x1cd   :  { %1056 = vrot.lane.b32.xlu1 %v3001_v41, %s2434_s2 }
 0x1ce   :  { %v934_v14 = vpop.permute.xlu1 %933 }
 0x1cf   :  { %v3018_v10 = vmax.f32 %v860_v34, %v934_v14  ;;  %935 = vrot.lane.b32.xlu0 %v861_v19, %s2433_s0  ;;  %v896_v34 = vpop.permute.xlu0 %895  ;;  %2168 = vmatpush3.bf16.msra.mxu0 %v2383_v27 }
 0x1d0   :  { %v3036_v38 = vmax.f32 %v841_v20, %v896_v34  ;;  %v2384_v20 = vld [vmem:[%s3322_s3 + $0xc8] sm:$0xff]   ;;  %2169 = vmatprep.subr.bf16.mxu0 %v2386_v58 }
 0x1d1   :  { %1058 = vrot.lane.b32.xlu1 %v3018_v10, %s2434_s2  ;;  %2185 = vmatprep.subr.bf16.mxu1 %v2384_v20  ;;  %v2400_v34 = vld [vmem:[%s3322_s3 + $0xe8] sm:$0xff]  }
 0x1d2   :  { %v910_v32 = vpop.permute.xlu1 %909  ;;  %2186 = vmatpush3.bf16.msra.mxu1 %v2385_v44 }
 0x1d3   :  { %v3030_v16 = vmax.f32 %v848_v52, %v910_v32  ;;  %2170 = vmatpush3.bf16.msra.mxu0 %v2387_v61  ;;  %2187 = vmatprep.subr.bf16.mxu1 %v2389_v0 }
 0x1d5   :  { %1034 = vrot.lane.b32.xlu1 %v3030_v16, %s2434_s2 }
 0x1d6   :  { %v888_v36 = vpop.permute.xlu1 %887 }
 0x1d7   :  { %v3040_v40 = vmax.f32 %v837_v54, %v888_v36 }
 0x1d9   :  { %1020 = vrot.lane.b32.xlu1 %v3036_v38, %s2434_s2  ;;  %1012 = vrot.lane.b32.xlu0 %v3040_v40, %s2434_s2 }
 0x1e9   :  { %v1015_v52 = vpop.permute.xlu1 %1014 }
 0x1ea   :  { %v1088_v54 = vmax.f32 %v2887_v55, %v1015_v52  ;;  %v2388_v55 = vld [vmem:[%s3322_s3 + $0x68] sm:$0xff]  }
 0x1eb   :  { %2171 = vmatprep.subr.bf16.mxu0 %v2388_v55 }
 0x1ec   :  { %1115 = vrot.lane.b32.xlu0 %v1088_v54, %s2435_s11  ;;  %2172 = vmatpush3.bf16.msra.mxu0 %v2390_v42  ;;  %v2415_v54 = vld [vmem:[%s3322_s3 + $0xf8] sm:$0xff]  }
 0x1ed   :  { %2173 = vmatprep.subr.bf16.mxu0 %v2392_v21 }
 0x1ef   :  { %v1017_v18 = vpop.permute.xlu1 %1016 }
 0x1f0   :  { %v1089_v30 = vmax.f32 %v2893_v59, %v1017_v18  ;;  %v2391_v59 = vld [vmem:[%s3322_s3 + $0x90] sm:$0xff]   ;;  %2174 = vmatpush3.bf16.msra.mxu0 %v2393_v31  ;;  %v2417_v18 = vld [vmem:[%s3322_s3 + $0xb8] sm:$0xff]  }
 0x1f1   :  { %2188 = vmatpush3.bf16.msra.mxu1 %v2391_v59  ;;  %2175 = vmatprep.subr.bf16.mxu0 %v2394_v47 }
 0x1f2   :  { %1121 = vrot.lane.b32.xlu0 %v1089_v30, %s2434_s2  ;;  %2189 = vmatprep.subr.bf16.mxu1 %v2396_v23 }
 0x1f4   :  { %2176 = vmatpush3.bf16.msra.mxu0 %v2395_v22 }
 0x1f5   :  { %2190 = vmatpush3.bf16.msra.mxu1 %v2397_v24 }
 0x1f9   :  { %v1023_v12 = vpop.permute.xlu0 %1022 }
 0x1fa   :  { %v1092_v9 = vmax.f32 %v2899_v62, %v1023_v12  ;;  %v2436_v12 = vmov 0.0  }
 0x1fc   :  { %1134 = vrot.lane.b32.xlu1 %v1092_v9, %s2435_s11 }
 0x1ff   :  { %v1025_v4 = vpop.permute.xlu0 %1024 }
 0x200   :  { %v1093_v62 = vmax.f32 %v2905_v33, %v1025_v4 }
 0x202   :  { %1139 = vrot.lane.b32.xlu1 %v1093_v62, %s2434_s2 }
 0x203   :  { %v1027_v28 = vpop.permute.xlu0 %1026  ;;  %v1019_v39 = vpop.permute.xlu1 %1018 }
 0x204   :  { %v1094_v53 = vmax.f32 %v2911_v45, %v1027_v28  ;;  %v1090_v6 = vmax.f32 %v2915_v60, %v1019_v39 }
 0x206   :  { %1144 = vrot.lane.b32.xlu1 %v1094_v53, %s2433_s0  ;;  %1127 = vrot.lane.b32.xlu0 %v1090_v6, %s2433_s0 }
 0x207   :  { %v928_v33 = vpop.permute.xlu0 %927  ;;  %v912_v14 = vpop.permute.xlu1 %911 }
 0x208   :  { %v3111_v45 = vmax.f32 %v857_v8, %v928_v33  ;;  %v3115_v60 = vmax.f32 %v849_v63, %v912_v14  ;;  %v2398_v63 = vld [vmem:[%s3322_s3 + $0xe0] sm:$0xff]  }
 0x209   :  { %2191 = vmatprep.subr.bf16.mxu1 %v2398_v63  ;;  %v2410_v63 = vld [vmem:[%s3322_s3 + $0x158] sm:$0xff]  }
 0x20a   :  { %1052 = vrot.lane.b32.xlu1 %v3111_v45, %s2434_s2  ;;  %1036 = vrot.lane.b32.xlu0 %v3115_v60, %s2434_s2 }
 0x20b   :  { %v920_v49 = vpop.permute.xlu0 %919  ;;  %v904_v2 = vpop.permute.xlu1 %903  ;;  %2192 = vmatpush3.bf16.msra.mxu1 %v2399_v48  ;;  %v2411_v48 = vld [vmem:[%s3322_s3 + $0x118] sm:$0xff]  }
 0x20c   :  { %v3123_v3 = vmax.f32 %v853_v11, %v920_v49  ;;  %v3127_v37 = vmax.f32 %v845_v46, %v904_v2  ;;  %2193 = vmatprep.subr.bf16.mxu1 %v2400_v34  ;;  %v2405_v2 = vld [vmem:[%s3322_s3 + $0x108] sm:$0xff]   ;;  %v2418_v34 = vld [vmem:[%s3322_s3 + $0x170] sm:$0xff]  }
 0x20e   :  { %1044 = vrot.lane.b32.xlu1 %v3123_v3, %s2434_s2  ;;  %1028 = vrot.lane.b32.xlu0 %v3127_v37, %s2434_s2 }
 0x20f   :  { %v1031_v1 = vpop.permute.xlu0 %1030 }
 0x210   :  { %v1096_v8 = vmax.f32 %v2939_v15, %v1031_v1  ;;  %v2401_v15 = vld [vmem:[%s3322_s3 + $0xa8] sm:$0xff]   ;;  %v2409_v1 = vld [vmem:[%s3322_s3 + $0x110] sm:$0xff]  }
 0x211   :  { %2194 = vmatpush3.bf16.msra.mxu1 %v2401_v15 }
 0x212   :  { %1150 = vrot.lane.b32.xlu1 %v1096_v8, %s2435_s11  ;;  %2195 = vmatprep.subr.bf16.mxu1 %v2406_v57 }
 0x213   :  { %v1033_v26 = vpop.permute.xlu0 %1032 }
 0x214   :  { %v1097_v46 = vmax.f32 %v2945_v5, %v1033_v26  ;;  %v2402_v5 = vld [vmem:[%s3322_s3 + $0x140] sm:$0xff]  }
 0x215   :  { %2205 = vmatprep.subr.bf16.mxu0 %v2402_v5  ;;  %v2412_v26 = vld [vmem:[%s3322_s3 + $0x160] sm:$0xff]   ;;  %v2420_v5 = vld [vmem:[%s3322_s3 + $0x178] sm:$0xff]  }
 0x216   :  { %1155 = vrot.lane.b32.xlu1 %v1097_v46, %s2434_s2  ;;  %v2413_v46 = vld [vmem:[%s3322_s3 + $0x120] sm:$0xff]  }
 0x219   :  { %v1039_v11 = vpop.permute.xlu1 %1038 }
 0x21a   :  { %v1100_v29 = vmax.f32 %v2951_v17, %v1039_v11  ;;  %v2414_v11 = vld [vmem:[%s3322_s3 + $0x168] sm:$0xff]  }
 0x21c   :  { %1166 = vrot.lane.b32.xlu0 %v1100_v29, %s2435_s11 }
 0x21f   :  { %v1041_v32 = vpop.permute.xlu1 %1040 }
 0x220   :  { %v1101_v36 = vmax.f32 %v2957_v35, %v1041_v32  ;;  %v2408_v35 = vld [vmem:[%s3322_s3 + $0xb0] sm:$0xff]   ;;  %v2416_v32 = vld [vmem:[%s3322_s3 + $0x128] sm:$0xff]  }
 0x221   :  { %2196 = vmatpush3.bf16.msra.mxu1 %v2408_v35 }
 0x222   :  { %1171 = vrot.lane.b32.xlu0 %v1101_v36, %s2434_s2  ;;  %2197 = vmatprep.subr.bf16.mxu1 %v2415_v54  ;;  %v2419_v36 = vld [vmem:[%s3322_s3 + $0x130] sm:$0xff]  }
 0x223   :  { %v1043_v17 = vpop.permute.xlu1 %1042 }
 0x224   :  { %v1102_v51 = vmax.f32 %v2963_v50, %v1043_v17  ;;  %v2421_v17 = vld [vmem:[%s3322_s3 + $0x138] sm:$0xff]  }
 0x225   :  { %2198 = vmatpush3.bf16.msra.mxu1 %v2417_v18 }
 0x226   :  { %1176 = vrot.lane.b32.xlu0 %v1102_v51, %s2433_s0  ;;  %2247 = vmatprep.subr.bf16.mxu1 %v2436_v12 }
 0x229   :  { %v1047_v27 = vpop.permute.xlu0 %1046 }
 0x22a   :  { %v1104_v20 = vmax.f32 %v2969_v7, %v1047_v27 }
 0x22c   :  { %1182 = vrot.lane.b32.xlu1 %v1104_v20, %s2435_s11 }
 0x22f   :  { %v1049_v44 = vpop.permute.xlu0 %1048 }
 0x230   :  { %v1105_v50 = vmax.f32 %v2975_v25, %v1049_v44 }
 0x232   :  { %1187 = vrot.lane.b32.xlu1 %v1105_v50, %s2434_s2 }
 0x239   :  { %v1055_v52 = vpop.permute.xlu0 %1054 }
 0x23a   :  { %v1108_v58 = vmax.f32 %v2987_v56, %v1055_v52 }
 0x23c   :  { %1198 = vrot.lane.b32.xlu1 %v1108_v58, %s2435_s11 }
 0x23d   :  { %v1051_v7 = vpop.permute.xlu0 %1050 }
 0x23e   :  { %v1106_v25 = vmax.f32 %v2993_v13, %v1051_v7 }
 0x23f   :  { %v1057_v61 = vpop.permute.xlu1 %1056 }
 0x240   :  { %v1109_v30 = vmax.f32 %v3001_v41, %v1057_v61  ;;  %1192 = vrot.lane.b32.xlu1 %v1106_v25, %s2433_s0 }
 0x241   :  { %v936_v55 = vpop.permute.xlu0 %935 }
 0x242   :  { %v3181_v0 = vmax.f32 %v861_v19, %v936_v55  ;;  %1203 = vrot.lane.b32.xlu0 %v1109_v30, %s2434_s2  ;;  %v2422_v30 = vld [vmem:[%s3322_s3 + $0x180] sm:$0xff]  }
 0x243   :  { %v1059_v56 = vpop.permute.xlu1 %1058 }
 0x244   :  { %v1110_v42 = vmax.f32 %v3018_v10, %v1059_v56  ;;  %1060 = vrot.lane.b32.xlu1 %v3181_v0, %s2434_s2 }
 0x246   :  { %1208 = vrot.lane.b32.xlu0 %v1110_v42, %s2433_s0  ;;  %v2423_v42 = vld [vmem:[%s3322_s3 + $0x188] sm:$0xff]  }
 0x247   :  { %v1035_v13 = vpop.permute.xlu1 %1034 }
 0x248   :  { %v1098_v41 = vmax.f32 %v3030_v16, %v1035_v13 }
 0x24a   :  { %1160 = vrot.lane.b32.xlu0 %v1098_v41, %s2433_s0 }
 0x24b   :  { %v1013_v43 = vpop.permute.xlu0 %1012  ;;  %v1021_v19 = vpop.permute.xlu1 %1020 }
 0x24c   :  { %v1087_v59 = vmax.f32 %v3040_v40, %v1013_v43  ;;  %v1091_v10 = vmax.f32 %v3036_v38, %v1021_v19  ;;  %v2424_v43 = vld [vmem:[%s3323_s5] sm:$0xff]   ;;  %v2425_v19 = vld [vmem:[%s3323_s5 + $0x8] sm:$0xff]  }
 0x24e   :  { %1113 = vst.msk [vmem:[#allocation2] sm:$0xff] %vm1112_vm1, %v1087_v59  ;;  %1132 = vst.msk [vmem:[#allocation2 + $0x8] sm:$0xff] %vm1112_vm1, %v1091_v10  ;;  %v2426_v59 = vld [vmem:[%s3323_s5 + $0x10] sm:$0xff]   ;;  %v2427_v10 = vld [vmem:[%s3323_s5 + $0x18] sm:$0xff]  }
 0x25e   :  { %v1116_v21 = vpop.permute.xlu0 %1115 }
 0x25f   :  { %1119 = vst.msk [vmem:[#allocation2] sm:$0xff] %vm1118_vm2, %v1116_v21  ;;  %v2428_v21 = vld [vmem:[%s3323_s5 + $0x20] sm:$0xff]  }
 0x264   :  { %v1122_v9 = vpop.permute.xlu0 %1121 }
 0x265   :  { %1125 = vst.msk [vmem:[#allocation2] sm:$0xff] %vm1124_vm3, %v1122_v9  ;;  %v2429_v9 = vld [vmem:[%s3323_s5 + $0x28] sm:$0xff]  }
 0x26e   :  { %v1135_v16 = vpop.permute.xlu1 %1134 }
 0x26f   :  { %1137 = vst.msk [vmem:[#allocation2 + $0x8] sm:$0xff] %vm1118_vm2, %v1135_v16  ;;  %v2430_v16 = vld [vmem:[%s3323_s5 + $0x30] sm:$0xff]  }
 0x274   :  { %v1140_v31 = vpop.permute.xlu1 %1139 }
 0x275   :  { %1142 = vst.msk [vmem:[#allocation2 + $0x8] sm:$0xff] %vm1124_vm3, %v1140_v31  ;;  %v2431_v31 = vld [vmem:[%s3323_s5 + $0x38] sm:$0xff]  }
 0x278   :  { %v1128_v38 = vpop.permute.xlu0 %1127  ;;  %v1145_v40 = vpop.permute.xlu1 %1144 }
 0x279   :  { %1131 = vst.msk [vmem:[#allocation2] sm:$0xff] %vm1130_vm4, %v1128_v38  ;;  %1147 = vst.msk [vmem:[#allocation2 + $0x8] sm:$0xff] %vm1130_vm4, %v1145_v40 }
 0x27c   :  { %v1037_v47 = vpop.permute.xlu0 %1036  ;;  %v1053_v4 = vpop.permute.xlu1 %1052 }
 0x27d   :  { %v1099_v22 = vmax.f32 %v3115_v60, %v1037_v47  ;;  %v1107_v62 = vmax.f32 %v3111_v45, %v1053_v4  ;;  %v2403_v60 = vld [vmem:[%s3322_s3 + $0x100] sm:$0xff]   ;;  %v2404_v45 = vld [vmem:[%s3322_s3 + $0x148] sm:$0xff]  }
 0x27f   :  { %1164 = vst.msk [vmem:[#allocation2 + $0x18] sm:$0xff] %vm1112_vm1, %v1099_v22  ;;  %1196 = vst.msk [vmem:[#allocation2 + $0x28] sm:$0xff] %vm1112_vm1, %v1107_v62 }
 0x280   :  { %v1029_v28 = vpop.permute.xlu0 %1028  ;;  %v1045_v39 = vpop.permute.xlu1 %1044  ;;  %v1214_v53 = vld [vmem:[#allocation2 + $0x8] sm:$0xff]  ;;  %v1213_v6 = vld [vmem:[#allocation2] sm:$0xff] }
 0x281   :  { %v1095_v23 = vmax.f32 %v3127_v37, %v1029_v28  ;;  %v1103_v24 = vmax.f32 %v3123_v3, %v1045_v39  ;;  %v1221_v33 = vpack.c.bf16 %v1214_v53, %v1214_v53  ;;  %v1220_v14 = vpack.c.bf16 %v1213_v6, %v1213_v6  ;;  %v2407_v3 = vld [vmem:[%s3322_s3 + $0x150] sm:$0xff]   ;;  %v2006_v39 = vld [vmem:[%s3324_s4] ss:$0 sm:$0xff] }
 0x283   :  { %1148 = vst.msk [vmem:[#allocation2 + $0x10] sm:$0xff] %vm1112_vm1, %v1095_v23  ;;  %1180 = vst.msk [vmem:[#allocation2 + $0x20] sm:$0xff] %vm1112_vm1, %v1103_v24  ;;  %1669 = vmatprep.mubr.bf16.mxu0 %v1221_v33 }
 0x284   :  { %1670 = vmatmul.mubr.bf16.vlgmr.msra.gmra.mrb[52].mxu0 %v1220_v14  ;;  %v1151_v49 = vpop.permute.xlu1 %1150 }
 0x285   :  { %1153 = vst.msk [vmem:[#allocation2 + $0x10] sm:$0xff] %vm1118_vm2, %v1151_v49  ;;  %2206 = vmatpush3.bf16.msra.mxu0 %v2403_v60 }
 0x286   :  { %2207 = vmatprep.subr.bf16.mxu0 %v2404_v45 }
 0x288   :  { %v1156_v37 = vpop.permute.xlu1 %1155 }
 0x289   :  { %1158 = vst.msk [vmem:[#allocation2 + $0x10] sm:$0xff] %vm1124_vm3, %v1156_v37  ;;  %2208 = vmatpush3.bf16.msra.mxu0 %v2405_v2 }
 0x28a   :  { %2209 = vmatprep.subr.bf16.mxu0 %v2407_v3 }
 0x28d   :  { %2210 = vmatpush3.bf16.msra.mxu0 %v2409_v1 }
 0x28e   :  { %v1167_v8 = vpop.permute.xlu0 %1166  ;;  %2211 = vmatprep.subr.bf16.mxu0 %v2410_v63 }
 0x28f   :  { %1169 = vst.msk [vmem:[#allocation2 + $0x18] sm:$0xff] %vm1118_vm2, %v1167_v8 }
 0x291   :  { %2212 = vmatpush3.bf16.msra.mxu0 %v2411_v48 }
 0x292   :  { %2213 = vmatprep.subr.bf16.mxu0 %v2412_v26 }
 0x294   :  { %v1172_v29 = vpop.permute.xlu0 %1171 }
 0x295   :  { %1174 = vst.msk [vmem:[#allocation2 + $0x18] sm:$0xff] %vm1124_vm3, %v1172_v29  ;;  %2214 = vmatpush3.bf16.msra.mxu0 %v2413_v46  ;;  %v2058_v46 = vld [vmem:[%s3325_s6] ss:$0 sm:$0xff] }
 0x296   :  { %2215 = vmatprep.subr.bf16.mxu0 %v2414_v11 }
 0x298   :  { %v1177_v15 = vpop.permute.xlu0 %1176 }
 0x299   :  { %1179 = vst.msk [vmem:[#allocation2 + $0x18] sm:$0xff] %vm1130_vm4, %v1177_v15  ;;  %2216 = vmatpush3.bf16.msra.mxu0 %v2416_v32 }
 0x29a   :  { %2217 = vmatprep.subr.bf16.mxu0 %v2418_v34 }
 0x29d   :  { %2218 = vmatpush3.bf16.msra.mxu0 %v2419_v36 }
 0x29e   :  { %v1183_v51 = vpop.permute.xlu1 %1182  ;;  %2219 = vmatprep.subr.bf16.mxu0 %v2420_v5 }
 0x29f   :  { %1185 = vst.msk [vmem:[#allocation2 + $0x20] sm:$0xff] %vm1118_vm2, %v1183_v51 }
 0x2a0   :  { %v1216_v57 = vld [vmem:[#allocation2 + $0x18] sm:$0xff] }
 0x2a1   :  { %v1223_v35 = vpack.c.bf16 %v1216_v57, %v1216_v57  ;;  %2220 = vmatpush3.bf16.msra.mxu0 %v2421_v17 }
 0x2a2   :  { %2239 = vmatprep.subr.bf16.mxu0 %v2436_v12 }
 0x2a3   :  { %1709 = vmatprep.mubr.bf16.mxu1 %v1223_v35 }
 0x2a4   :  { %v1188_v27 = vpop.permute.xlu1 %1187 }
 0x2a5   :  { %1190 = vst.msk [vmem:[#allocation2 + $0x20] sm:$0xff] %vm1124_vm3, %v1188_v27 }
 0x2ae   :  { %v1199_v20 = vpop.permute.xlu1 %1198 }
 0x2af   :  { %1201 = vst.msk [vmem:[#allocation2 + $0x28] sm:$0xff] %vm1118_vm2, %v1199_v20 }
 0x2b2   :  { %v1193_v44 = vpop.permute.xlu1 %1192 }
 0x2b3   :  { %1195 = vst.msk [vmem:[#allocation2 + $0x20] sm:$0xff] %vm1130_vm4, %v1193_v44 }
 0x2b4   :  { %v1204_v50 = vpop.permute.xlu0 %1203 }
 0x2b5   :  { %1206 = vst.msk [vmem:[#allocation2 + $0x28] sm:$0xff] %vm1124_vm3, %v1204_v50 }
 0x2b6   :  { %v1061_v52 = vpop.permute.xlu1 %1060 }
 0x2b7   :  { %v1111_v54 = vmax.f32 %v3181_v0, %v1061_v52 }
 0x2b8   :  { %v1209_v18 = vpop.permute.xlu0 %1208 }
 0x2b9   :  { %1212 = vst.msk [vmem:[#allocation2 + $0x30] sm:$0xff] %vm1112_vm1, %v1111_v54 }
 0x2ba   :  { %1211 = vst.msk [vmem:[#allocation2 + $0x28] sm:$0xff] %vm1130_vm4, %v1209_v18  ;;  %v1217_v7 = vld [vmem:[#allocation2 + $0x20] sm:$0xff] }
 0x2bb   :  { %v1224_v55 = vpack.c.bf16 %v1217_v7, %v1217_v7 }
 0x2bc   :  { %v1161_v58 = vpop.permute.xlu0 %1160 }
 0x2bd   :  { %1163 = vst.msk [vmem:[#allocation2 + $0x10] sm:$0xff] %vm1130_vm4, %v1161_v58 }
 0x2c0   :  { %v1219_v13 = vld [vmem:[#allocation2 + $0x30] sm:$0xff] }
 0x2c1   :  { %v1218_v25 = vld [vmem:[#allocation2 + $0x28] sm:$0xff]  ;;  %v1226_v41 = vpack.c.bf16 %v1219_v13, %v1219_v13 }
 0x2c2   :  { %v1225_v61 = vpack.c.bf16 %v1218_v25, %v1218_v25 }
 0x2c4   :  { %1749 = vmatprep.mubr.bf16.mxu0 %v1225_v61  ;;  %v1215_v56 = vld [vmem:[#allocation2 + $0x10] sm:$0xff] }
 0x2c5   :  { %1750 = vmatmul.mubr.bf16.vlgmr.msra.gmra.mrb[56].mxu0 %v1224_v55  ;;  %v1222_v0 = vpack.c.bf16 %v1215_v56, %v1215_v56 }
 0x2c6   :  { %2240 = vmatpush3.bf16.msra.mxu0 %v2422_v30  ;;  %2243 = vmatprep.mubr.msk.bf16.mxu0 %vm2437_vm5, %v2436_v12 }
 0x2c7   :  { %2241 = vmatprep.subr.bf16.mxu0 %v2436_v12  ;;  %1710 = vmatmul.mubr.bf16.vlgmr.msra.gmra.mrb[52].mxu1 %v1222_v0 }
 0x2c8   :  { %2263 = vmatprep.mubr.msk.bf16.mxu1 %vm2437_vm5, %v2436_v12  ;;  %2248 = vmatpush3.bf16.msra.mxu1 %v2424_v43 }
 0x2c9   :  { %2249 = vmatprep.subr.bf16.mxu1 %v2436_v12 }
 0x2ca   :  { %2242 = vmatpush3.bf16.msra.mxu0 %v2423_v42 }
 0x2cc   :  { %2250 = vmatpush3.bf16.msra.mxu1 %v2425_v19 }
 0x2cd   :  { %2244 = vmatmul.mubr.msk.bf16.vlgmr.msra.gmra.mrb[60].mxu0 %vm1112_vm1, %v1226_v41  ;;  %2251 = vmatprep.subr.bf16.mxu1 %v2436_v12 }
 0x2d0   :  { %2252 = vmatpush3.bf16.msra.mxu1 %v2426_v59 }
 0x2d1   :  { %2253 = vmatprep.subr.bf16.mxu1 %v2436_v12 }
 0x2d4   :  { %2254 = vmatpush3.bf16.msra.mxu1 %v2427_v10 }
 0x2d5   :  { %2255 = vmatprep.subr.bf16.mxu1 %v2436_v12 }
 0x2d8   :  { %2256 = vmatpush3.bf16.msra.mxu1 %v2428_v21 }
 0x2d9   :  { %2257 = vmatprep.subr.bf16.mxu1 %v2436_v12 }
 0x2dc   :  { %2258 = vmatpush3.bf16.msra.mxu1 %v2429_v9 }
 0x2dd   :  { %2259 = vmatprep.subr.bf16.mxu1 %v2436_v12 }
 0x2e0   :  { %2260 = vmatpush3.bf16.msra.mxu1 %v2430_v16 }
 0x2e1   :  { %2261 = vmatprep.subr.bf16.mxu1 %v2436_v12 }
 0x2e4   :  { %2262 = vmatpush3.bf16.msra.mxu1 %v2431_v31 }
 0x357   :  { %v2177_v38 = vpop.f32.mrb[52].mxu0 }
 0x358   :  { %v2178_v40 = vpop.f32.mrb[53].mxu0 }
 0x359   :  { %v2179_v47 = vadd.f32 %v2178_v40, %v2177_v38  ;;  %v2180_v4 = vpop.f32.mrb[54].mxu0 }
 0x35a   :  { %v2181_v22 = vpop.f32.mrb[55].mxu0 }
 0x35b   :  { %v1672_v33 = vadd.f32 %v2179_v47, %v2006_v39 }
 0x398   :  { %v2221_v62 = vpop.f32.mrb[56].mxu0 }
 0x399   :  { %v2222_v28 = vpop.f32.mrb[57].mxu0 }
 0x39a   :  { %v2223_v53 = vadd.f32 %v2222_v28, %v2221_v62  ;;  %v2224_v6 = vpop.f32.mrb[58].mxu0  ;;  %v2199_v23 = vpop.f32.mrb[52].mxu1 }
 0x39b   :  { %v2225_v12 = vpop.f32.mrb[59].mxu0  ;;  %v2200_v24 = vpop.f32.mrb[53].mxu1 }
 0x39c   :  { %v2201_v14 = vadd.f32 %v2200_v24, %v2199_v23  ;;  %v2202_v60 = vpop.f32.mrb[54].mxu1 }
 0x39d   :  { %v2203_v45 = vpop.f32.mrb[55].mxu1 }
 0x39e   :  { %v1712_v49 = vadd.f32 %v2201_v14, %v1672_v33 }
 0x3a0   :  { %v1791_v2 = vpop.f32.mrb[60].mxu0  ;;  %v1752_v3 = vadd.f32 %v2223_v53, %v1712_v49 }
 0x3a1   :  { %v2245_v37 = vpop.f32.mrb[61].mxu0 }
 0x3a2   :  { %v1794_v1 = vpop.f32.mrb[62].mxu0  ;;  %v1792_v63 = vadd.f32 %v1791_v2, %v1752_v3 }
 0x3a3   :  { %v2246_v48 = vpop.f32.mrb[63].mxu0 }
 0x3a4   :  { %v1797_v8 = vmax.f32 %v1792_v63, 0.0 }
 0x3a6   :  { %v1798_v26 = vpack.c.bf16 %v1797_v8, %v1797_v8 }
 0x3a8   :  { %2264 = vmatmul.mubr.bf16.vlgmr.msra.gmra.mrb[56].mxu1 %v1798_v26 }
 0x47b   :  { %v1904_v11 = vpop.f32.mrb[56].mxu1 }
 0x47c   :  { %v1905_v29 = vadd.f32 %v2058_v46, %v1904_v11  ;;  %v2265_v32 = vpop.f32.mrb[57].mxu1 }
 0x47d   :  { %v1907_v34 = vpop.f32.mrb[58].mxu1 }
 0x47e   :  { %1910 = vst [vmem:[%s3326_s7] sm:$0xff] %v1905_v29  ;;  %v2266_v15 = vpop.f32.mrb[59].mxu1 }

</bundles_post_ra>
